<compile_context>
chip_gen: v7x
topology: tpu7x:2x2x1
jax: 0.10.0
libtpu: 0.0.40
codegen_flags: <defaults>
</compile_context>

<pallas_src>
import math
from functools import partial

import jax
import jax.numpy as jnp
from jax.experimental import pallas as pl
from jax.experimental.pallas import tpu as pltpu

# ----------------------------- configuration -------------------------------
B_DEF = 2        # batch
CIN_DEF = 4      # input channels
HW_DEF = 16      # spatial H = W
FEAT_DIM = 32    # backbone feature dim (stand-in for resnet fc.in_features)
HID_DIM = 16     # PosteriorNet.hid_dim
LEN_FLOW = 16    # PosteriorNet.len_flow
NUM_CLASS = 3    # num_class

KPAD = 128       # padded im2col K (9*Cin weights + bias column + zeros)
FPAD = 128       # padded feature dim (lane-dense; col FPAD-1 = constant 1)
CHUNK = 128      # conv rows streamed per step

_LOG_2PI = math.log(2.0 * math.pi)
_VMEM = pl.BlockSpec(memory_space=pltpu.MemorySpace.VMEM)


# ------------------------------ Pallas kernel --------------------------------
def posterior_kernel(patches_ref, wconv_ref, pool_ref, wfc_ref, flow_ref,
                     feat_ref, logq_ref):
    """Fused: streamed conv-stem (im2col matmul) + ReLU + GAP (as MXU matmul,
    replicated per class) -> fc with folded bias/BatchNorm -> per-class radial
    flows (vectorized over classes) -> standard-MVN log_prob.

    patches_ref : (B*H*W, KPAD)     im2col patches, col 9*Cin == 1.0 (bias)
    wconv_ref   : (KPAD, FPAD)      conv weights; row 9*Cin = conv bias;
                                    col FPAD-1 produces a constant-1 feature
    pool_ref    : (C*B, B*H*W)      class-replicated global-average-pool matrix
    wfc_ref     : (FPAD, D)         fc weight * BN scale; row FPAD-1 = BN shift
    flow_ref    : (L, C*B, D+2)     [z0 | alpha | beta] per flow step
    feat_ref    : (B, FPAD)         backbone features (padded, lane-dense)
    logq_ref    : (C*B, 128)        log q(z_K), lane-broadcast per row
    """
    n_rows = patches_ref.shape[0]
    fpad = wconv_ref.shape[1]
    batch = feat_ref.shape[0]
    cb = pool_ref.shape[0]
    dim_h = wfc_ref.shape[1]
    n_flow = flow_ref.shape[0]

    # ---- backbone: streamed conv-as-matmul + ReLU + (replicated) GAP --------
    # Pool is done on the MXU; per-chunk live state is <= ~50 vregs, the full
    # (n_rows, FPAD) ReLU intermediate is never materialized.
    wconv = wconv_ref[...]                                   # (KPAD, FPAD)
    acc = jnp.zeros((cb, fpad), jnp.float32)                 # pooled, per class
    n_full = (n_rows // CHUNK) * CHUNK
    for r0 in range(0, n_full, CHUNK):
        yc = jnp.maximum(
            jnp.dot(patches_ref[r0:r0 + CHUNK, :], wconv,
                    preferred_element_type=jnp.float32), 0.0)
        acc = acc + jnp.dot(pool_ref[:, r0:r0 + CHUNK], yc,
                            preferred_element_type=jnp.float32)
    if n_full < n_rows:                                      # static remainder
        yc = jnp.maximum(
            jnp.dot(patches_ref[n_full:n_rows, :], wconv,
                    preferred_element_type=jnp.float32), 0.0)
        acc = acc + jnp.dot(pool_ref[:, n_full:n_rows], yc,
                            preferred_element_type=jnp.float32)

    # First `batch` rows are the (padded) backbone features; lane-dense store.
    feat_ref[...] = acc[:batch, :]

    # ---- head: fc (bias + eval-mode BatchNorm folded into wfc) --------------
    # acc already replicated per class -> z starts as (C*B, D) directly.
    z = jnp.dot(acc, wfc_ref[...], preferred_element_type=jnp.float32)

    # ---- radial flows, vectorized over classes (serial chain of length L) ---
    # log|det J| factors accumulated as products; log taken every 8 steps.
    sum_ldj = jnp.zeros((cb, 1), jnp.float32)
    p1 = jnp.ones((cb, 1), jnp.float32)
    p2 = jnp.ones((cb, 1), jnp.float32)
    for l in range(n_flow):
        z0 = flow_ref[l, :, 0:dim_h]                         # (C*B, D)
        alpha = flow_ref[l, :, dim_h:dim_h + 1]              # (C*B, 1)
        beta = flow_ref[l, :, dim_h + 1:dim_h + 2]           # (C*B, 1)
        diff = z - z0
        r = jnp.sqrt(jnp.sum(diff * diff, axis=-1, keepdims=True))
        h = pl.reciprocal(alpha + r, approx=True)            # EUP, off VALU
        bh = beta * h
        z = z + bh * diff
        # Jacobian factors (clamped: approx reciprocal error near r~0 could
        # otherwise push them non-positive).
        p1 = p1 * jnp.maximum(1.0 + bh, 1e-12)
        p2 = p2 * jnp.maximum(1.0 + bh - beta * h * h * r, 1e-12)
        if (l + 1) % 8 == 0 or l == n_flow - 1:
            sum_ldj = (sum_ldj
                       + (dim_h - 1) * jnp.log(jnp.maximum(p1, 1e-30))
                       + jnp.log(jnp.maximum(p2, 1e-30)))
            p1 = jnp.ones((cb, 1), jnp.float32)
            p2 = jnp.ones((cb, 1), jnp.float32)

    # standard multivariate normal (mean 0, cov I) log-prob of z_K
    log_prob_z = (-0.5 * jnp.sum(z * z, axis=-1, keepdims=True)
                  - 0.5 * dim_h * _LOG_2PI)                  # (C*B, 1)
    logq = log_prob_z + sum_ldj                              # (C*B, 1)
    # lane-dense epilogue store: broadcast across the 128-lane row.
    logq_ref[...] = jnp.broadcast_to(logq, (cb, logq_ref.shape[1]))


# ------------------------------- wrappers -----------------------------------
def init_params(key, cin=CIN_DEF, feat_dim=FEAT_DIM, hid_dim=HID_DIM,
                num_class=NUM_CLASS, len_flow=LEN_FLOW):
    ks = jax.random.split(key, 8)
    p = {}
    p["w_conv"] = 0.1 * jax.random.normal(ks[0], (3, 3, cin, feat_dim),
                                          jnp.float32)
    p["b_conv"] = 0.01 * jax.random.normal(ks[1], (feat_dim,), jnp.float32)
    p["w_fc"] = 0.1 * jax.random.normal(ks[2], (feat_dim, hid_dim), jnp.float32)
    p["b_fc"] = 0.01 * jax.random.normal(ks[3], (hid_dim,), jnp.float32)
    # BatchNorm1d defaults: gamma=1, beta=0, running_mean=0, running_var=1
    p["bn"] = jnp.stack([jnp.ones((hid_dim,), jnp.float32),
                         jnp.zeros((hid_dim,), jnp.float32),
                         jnp.zeros((hid_dim,), jnp.float32),
                         jnp.ones((hid_dim,), jnp.float32)], axis=0)
    # Radial flow parameters (per class, per flow step)
    p["flow_z0"] = 0.1 * jax.random.normal(ks[4], (num_class, len_flow, hid_dim),
                                           jnp.float32)
    a_raw = 1.0 + 0.1 * jax.random.normal(ks[5], (num_class, len_flow),
                                          jnp.float32)
    b_raw = 0.1 * jax.random.normal(ks[6], (num_class, len_flow), jnp.float32)
    alpha = jax.nn.softplus(a_raw)
    beta = -alpha + jax.nn.softplus(b_raw)        # guarantees invertibility
    p["flow_alpha"] = alpha
    p["flow_beta"] = beta
    return p


def prepare_kernel_params(params, batch, height, width):
    """Fold / pack parameters into the few lane-dense arrays the kernel wants.
    Depends only on params + input geometry; run once and reuse per call."""
    cin = params["w_conv"].shape[2]
    feat_dim = params["w_conv"].shape[3]
    hid_dim = params["w_fc"].shape[1]
    num_class, len_flow, _ = params["flow_z0"].shape
    k = 9 * cin
    hw = height * width
    assert k + 1 <= KPAD and feat_dim < FPAD

    # conv weights (KPAD, FPAD): rows 0..k-1 = im2col weights, row k = bias
    # (driven by a constant-1 column in the patches); column FPAD-1 produces a
    # feature that is exactly 1.0 after ReLU + GAP (carries the BN shift).
    w_im2col = params["w_conv"].reshape(k, feat_dim)
    wconv = jnp.zeros((KPAD, FPAD), jnp.float32)
    wconv = wconv.at[:k, :feat_dim].set(w_im2col)
    wconv = wconv.at[k, :feat_dim].set(params["b_conv"])
    wconv = wconv.at[k, FPAD - 1].set(1.0)

    # fc bias + eval-mode BatchNorm1d folded: scale into the fc weight,
    # shift into the constant-feature row.
    gamma, bn_beta, rmean, rvar = (params["bn"][0], params["bn"][1],
                                   params["bn"][2], params["bn"][3])
    scale = gamma * jax.lax.rsqrt(rvar + 1e-5)
    shift = bn_beta + (params["b_fc"] - rmean) * scale
    wfc = jnp.zeros((FPAD, hid_dim), jnp.float32)
    wfc = wfc.at[:feat_dim, :].set(params["w_fc"] * scale[None, :])
    wfc = wfc.at[FPAD - 1, :].set(shift)

    # class-replicated global-average-pool matrix (C*B, B*H*W): one MXU matmul
    # both pools the conv activations and replicates the features per class.
    pool = jnp.repeat(jnp.eye(batch, dtype=jnp.float32), hw, axis=1) / float(hw)
    pool_rep = jnp.tile(pool, (num_class, 1))

    # flow params packed per step: (L, C*B, hid+2) = [z0 | alpha | beta];
    # row index inside the kernel is c*B + b.
    z0_steps = jnp.repeat(jnp.transpose(params["flow_z0"], (1, 0, 2)),
                          batch, axis=1)                      # (L, C*B, D)
    alpha_steps = jnp.repeat(params["flow_alpha"].T[:, :, None], batch, axis=1)
    beta_steps = jnp.repeat(params["flow_beta"].T[:, :, None], batch, axis=1)
    flow_packed = jnp.concatenate([z0_steps, alpha_steps, beta_steps], axis=-1)

    return {"wconv": wconv, "wfc": wfc, "pool": pool_rep, "flow": flow_packed}


@partial(jax.jit, static_argnames=("feat_dim",))
def posterior_net_forward(x_nchw, kparams, feat_dim):
    """Forward pass mirroring PosteriorNet.forward.

    x_nchw: (B, Cin, H, W)  ->  (features (B, F, 1, 1), log_q_zk (B, C))
    """
    b, cin, h, w = x_nchw.shape
    k = 9 * cin
    hw = h * w
    cb = kparams["flow"].shape[1]
    num_class = cb // b

    # ---- glue: NCHW -> NHWC, pad, im2col (3x3/s1/p1), bias column, K pad ----
    x = jnp.transpose(x_nchw, (0, 2, 3, 1))                   # NHWC
    xp = jnp.pad(x, ((0, 0), (1, 1), (1, 1), (0, 0)))
    taps = [xp[:, dy:dy + h, dx:dx + w, :]
            for dy in range(3) for dx in range(3)]
    patches = jnp.concatenate(taps, axis=-1).reshape(b * hw, k)
    patches = jnp.pad(patches, ((0, 0), (0, KPAD - k)))
    patches = patches.at[:, k].set(1.0)                       # conv-bias driver

    # ---- single fused Pallas kernel ----
    feat_pad, logq_bcast = pl.pallas_call(
        posterior_kernel,
        out_shape=(jax.ShapeDtypeStruct((b, FPAD), jnp.float32),
                   jax.ShapeDtypeStruct((cb, 128), jnp.float32)),
        in_specs=[_VMEM] * 5,
        out_specs=(_VMEM, _VMEM),
    )(patches, kparams["wconv"], kparams["pool"], kparams["wfc"],
      kparams["flow"])

    features = feat_pad[:, :feat_dim].reshape(b, feat_dim, 1, 1)
    log_q_zk = jnp.transpose(logq_bcast[:, 0].reshape(num_class, b))  # (B, C)
    return features, log_q_zk


# --------------------------------- main --------------------------------------
if __name__ == "__main__":
    key = jax.random.PRNGKey(0)
    k_x, k_p = jax.random.split(key)
    x = jax.random.normal(k_x, (B_DEF, CIN_DEF, HW_DEF, HW_DEF), jnp.float32)
    params = init_params(k_p)
    kparams = prepare_kernel_params(params, B_DEF, HW_DEF, HW_DEF)

    features, log_q_zk = posterior_net_forward(x, kparams, feat_dim=FEAT_DIM)
    jax.block_until_ready((features, log_q_zk))

    assert features.shape == (B_DEF, FEAT_DIM, 1, 1)
    assert log_q_zk.shape == (B_DEF, NUM_CLASS)
    assert bool(jnp.all(jnp.isfinite(features)))
    assert bool(jnp.all(jnp.isfinite(log_q_zk)))
    print("KERNEL_OK")
</pallas_src>

<mosaic_0001>
module attributes {stable_mosaic.version = 11 : i64} {
  func.func @posterior_kernel(%arg0: memref<512x128xf32, #tpu.memory_space<vmem>>, %arg1: memref<128x128xf32, #tpu.memory_space<vmem>>, %arg2: memref<6x512xf32, #tpu.memory_space<vmem>>, %arg3: memref<128x16xf32, #tpu.memory_space<vmem>>, %arg4: memref<16x6x18xf32, #tpu.memory_space<vmem>>, %arg5: memref<2x128xf32, #tpu.memory_space<vmem>>, %arg6: memref<6x128xf32, #tpu.memory_space<vmem>>) attributes {dimension_semantics = [], scalar_prefetch = 0 : i64, scratch_operands = 0 : i64, tpu.core_type = #tpu.core_type<tc>} {
    %c0 = arith.constant 0 : index
    %c0_0 = arith.constant 0 : index
    %0 = vector.load %arg1[%c0, %c0_0] : memref<128x128xf32, #tpu.memory_space<vmem>>, vector<128x128xf32>
    %cst = arith.constant 0.000000e+00 : f32
    %1 = vector.broadcast %cst : f32 to vector<6x128xf32>
    %c0_1 = arith.constant 0 : index
    %c0_2 = arith.constant 0 : index
    %2 = vector.load %arg0[%c0_1, %c0_2] : memref<512x128xf32, #tpu.memory_space<vmem>>, vector<128x128xf32>
    %cst_3 = arith.constant dense<0.000000e+00> : vector<128x128xf32>
    %3 = tpu.matmul %2, %0, %cst_3 {dimension_numbers = #tpu.dot_dimension_numbers<[1], [0], [0], [1], [0, 0, 1, 1], [], []>} : vector<128x128xf32>, vector<128x128xf32>, vector<128x128xf32> -> vector<128x128xf32>
    %cst_4 = arith.constant 0.000000e+00 : f32
    %4 = vector.broadcast %cst_4 : f32 to vector<128x128xf32>
    %5 = arith.maximumf %3, %4 : vector<128x128xf32>
    %c0_5 = arith.constant 0 : index
    %c0_6 = arith.constant 0 : index
    %6 = vector.load %arg2[%c0_5, %c0_6] : memref<6x512xf32, #tpu.memory_space<vmem>>, vector<6x128xf32>
    %cst_7 = arith.constant dense<0.000000e+00> : vector<6x128xf32>
    %7 = tpu.matmul %6, %5, %cst_7 {dimension_numbers = #tpu.dot_dimension_numbers<[1], [0], [0], [1], [0, 0, 1, 1], [], []>} : vector<6x128xf32>, vector<128x128xf32>, vector<6x128xf32> -> vector<6x128xf32>
    %8 = arith.addf %1, %7 : vector<6x128xf32>
    %c128 = arith.constant 128 : index
    %c0_8 = arith.constant 0 : index
    %9 = vector.load %arg0[%c128, %c0_8] : memref<512x128xf32, #tpu.memory_space<vmem>>, vector<128x128xf32>
    %cst_9 = arith.constant dense<0.000000e+00> : vector<128x128xf32>
    %10 = tpu.matmul %9, %0, %cst_9 {dimension_numbers = #tpu.dot_dimension_numbers<[1], [0], [0], [1], [0, 0, 1, 1], [], []>} : vector<128x128xf32>, vector<128x128xf32>, vector<128x128xf32> -> vector<128x128xf32>
    %cst_10 = arith.constant 0.000000e+00 : f32
    %11 = vector.broadcast %cst_10 : f32 to vector<128x128xf32>
    %12 = arith.maximumf %10, %11 : vector<128x128xf32>
    %c0_11 = arith.constant 0 : index
    %c128_12 = arith.constant 128 : index
    %13 = vector.load %arg2[%c0_11, %c128_12] : memref<6x512xf32, #tpu.memory_space<vmem>>, vector<6x128xf32>
    %cst_13 = arith.constant dense<0.000000e+00> : vector<6x128xf32>
    %14 = tpu.matmul %13, %12, %cst_13 {dimension_numbers = #tpu.dot_dimension_numbers<[1], [0], [0], [1], [0, 0, 1, 1], [], []>} : vector<6x128xf32>, vector<128x128xf32>, vector<6x128xf32> -> vector<6x128xf32>
    %15 = arith.addf %8, %14 : vector<6x128xf32>
    %c256 = arith.constant 256 : index
    %c0_14 = arith.constant 0 : index
    %16 = vector.load %arg0[%c256, %c0_14] : memref<512x128xf32, #tpu.memory_space<vmem>>, vector<128x128xf32>
    %cst_15 = arith.constant dense<0.000000e+00> : vector<128x128xf32>
    %17 = tpu.matmul %16, %0, %cst_15 {dimension_numbers = #tpu.dot_dimension_numbers<[1], [0], [0], [1], [0, 0, 1, 1], [], []>} : vector<128x128xf32>, vector<128x128xf32>, vector<128x128xf32> -> vector<128x128xf32>
    %cst_16 = arith.constant 0.000000e+00 : f32
    %18 = vector.broadcast %cst_16 : f32 to vector<128x128xf32>
    %19 = arith.maximumf %17, %18 : vector<128x128xf32>
    %c0_17 = arith.constant 0 : index
    %c256_18 = arith.constant 256 : index
    %20 = vector.load %arg2[%c0_17, %c256_18] : memref<6x512xf32, #tpu.memory_space<vmem>>, vector<6x128xf32>
    %cst_19 = arith.constant dense<0.000000e+00> : vector<6x128xf32>
    %21 = tpu.matmul %20, %19, %cst_19 {dimension_numbers = #tpu.dot_dimension_numbers<[1], [0], [0], [1], [0, 0, 1, 1], [], []>} : vector<6x128xf32>, vector<128x128xf32>, vector<6x128xf32> -> vector<6x128xf32>
    %22 = arith.addf %15, %21 : vector<6x128xf32>
    %c384 = arith.constant 384 : index
    %c0_20 = arith.constant 0 : index
    %23 = vector.load %arg0[%c384, %c0_20] : memref<512x128xf32, #tpu.memory_space<vmem>>, vector<128x128xf32>
    %cst_21 = arith.constant dense<0.000000e+00> : vector<128x128xf32>
    %24 = tpu.matmul %23, %0, %cst_21 {dimension_numbers = #tpu.dot_dimension_numbers<[1], [0], [0], [1], [0, 0, 1, 1], [], []>} : vector<128x128xf32>, vector<128x128xf32>, vector<128x128xf32> -> vector<128x128xf32>
    %cst_22 = arith.constant 0.000000e+00 : f32
    %25 = vector.broadcast %cst_22 : f32 to vector<128x128xf32>
    %26 = arith.maximumf %24, %25 : vector<128x128xf32>
    %c0_23 = arith.constant 0 : index
    %c384_24 = arith.constant 384 : index
    %27 = vector.load %arg2[%c0_23, %c384_24] : memref<6x512xf32, #tpu.memory_space<vmem>>, vector<6x128xf32>
    %cst_25 = arith.constant dense<0.000000e+00> : vector<6x128xf32>
    %28 = tpu.matmul %27, %26, %cst_25 {dimension_numbers = #tpu.dot_dimension_numbers<[1], [0], [0], [1], [0, 0, 1, 1], [], []>} : vector<6x128xf32>, vector<128x128xf32>, vector<6x128xf32> -> vector<6x128xf32>
    %29 = arith.addf %22, %28 : vector<6x128xf32>
    %30 = vector.extract_strided_slice %29 {offsets = [0, 0], sizes = [2, 128], strides = [1, 1]} : vector<6x128xf32> to vector<2x128xf32>
    %c0_26 = arith.constant 0 : index
    %c0_27 = arith.constant 0 : index
    %31 = vector.load %arg5[%c0_26, %c0_27] : memref<2x128xf32, #tpu.memory_space<vmem>>, vector<2x128xf32>
    tpu.vector_store %arg5[%c0_26, %c0_27], %30 {strides = array<i32>} : memref<2x128xf32, #tpu.memory_space<vmem>>, vector<2x128xf32>,
    %c0_28 = arith.constant 0 : index
    %c0_29 = arith.constant 0 : index
    %32 = vector.load %arg3[%c0_28, %c0_29] : memref<128x16xf32, #tpu.memory_space<vmem>>, vector<128x16xf32>
    %cst_30 = arith.constant dense<0.000000e+00> : vector<6x16xf32>
    %33 = tpu.matmul %29, %32, %cst_30 {dimension_numbers = #tpu.dot_dimension_numbers<[1], [0], [0], [1], [0, 0, 1, 1], [], []>} : vector<6x128xf32>, vector<128x16xf32>, vector<6x16xf32> -> vector<6x16xf32>
    %cst_31 = arith.constant 0.000000e+00 : f32
    %34 = vector.broadcast %cst_31 : f32 to vector<6x1xf32>
    %cst_32 = arith.constant 1.000000e+00 : f32
    %35 = vector.broadcast %cst_32 : f32 to vector<6x1xf32>
    %cst_33 = arith.constant 1.000000e+00 : f32
    %36 = vector.broadcast %cst_33 : f32 to vector<6x1xf32>
    %c0_34 = arith.constant 0 : index
    %c0_35 = arith.constant 0 : index
    %c0_36 = arith.constant 0 : index
    %37 = vector.load %arg4[%c0_34, %c0_35, %c0_36] : memref<16x6x18xf32, #tpu.memory_space<vmem>>, vector<1x6x16xf32>
    %38 = vector.shape_cast %37 : vector<1x6x16xf32> to vector<6x16xf32>
    %c0_37 = arith.constant 0 : index
    %c0_38 = arith.constant 0 : index
    %c16 = arith.constant 16 : index
    %39 = vector.load %arg4[%c0_37, %c0_38, %c16] : memref<16x6x18xf32, #tpu.memory_space<vmem>>, vector<1x6x1xf32>
    %40 = vector.shape_cast %39 : vector<1x6x1xf32> to vector<6x1xf32>
    %c0_39 = arith.constant 0 : index
    %c0_40 = arith.constant 0 : index
    %c17 = arith.constant 17 : index
    %41 = vector.load %arg4[%c0_39, %c0_40, %c17] : memref<16x6x18xf32, #tpu.memory_space<vmem>>, vector<1x6x1xf32>
    %42 = vector.shape_cast %41 : vector<1x6x1xf32> to vector<6x1xf32>
    %43 = arith.subf %33, %38 : vector<6x16xf32>
    %44 = arith.mulf %43, %43 : vector<6x16xf32>
    %cst_41 = arith.constant dense<0.000000e+00> : vector<6xf32>
    %45 = vector.multi_reduction <add>, %44, %cst_41 [1] : vector<6x16xf32> to vector<6xf32>
    %46 = vector.shape_cast %45 : vector<6xf32> to vector<6x1xf32>
    %47 = math.sqrt %46 : vector<6x1xf32>
    %48 = arith.addf %40, %47 : vector<6x1xf32>
    %49 = tpu.reciprocal %48 {approx = true} : vector<6x1xf32> -> vector<6x1xf32>
    %50 = arith.mulf %42, %49 : vector<6x1xf32>
    %51 = vector.broadcast %50 : vector<6x1xf32> to vector<6x16xf32>
    %52 = arith.mulf %51, %43 : vector<6x16xf32>
    %53 = arith.addf %33, %52 : vector<6x16xf32>
    %cst_42 = arith.constant 1.000000e+00 : f32
    %54 = vector.broadcast %cst_42 : f32 to vector<6x1xf32>
    %55 = arith.addf %54, %50 : vector<6x1xf32>
    %cst_43 = arith.constant 9.99999996E-13 : f32
    %56 = vector.broadcast %cst_43 : f32 to vector<6x1xf32>
    %57 = arith.maximumf %55, %56 : vector<6x1xf32>
    %58 = arith.mulf %35, %57 : vector<6x1xf32>
    %cst_44 = arith.constant 1.000000e+00 : f32
    %59 = vector.broadcast %cst_44 : f32 to vector<6x1xf32>
    %60 = arith.addf %59, %50 : vector<6x1xf32>
    %61 = arith.mulf %42, %49 : vector<6x1xf32>
    %62 = arith.mulf %61, %49 : vector<6x1xf32>
    %63 = arith.mulf %62, %47 : vector<6x1xf32>
    %64 = arith.subf %60, %63 : vector<6x1xf32>
    %cst_45 = arith.constant 9.99999996E-13 : f32
    %65 = vector.broadcast %cst_45 : f32 to vector<6x1xf32>
    %66 = arith.maximumf %64, %65 : vector<6x1xf32>
    %67 = arith.mulf %36, %66 : vector<6x1xf32>
    %c1 = arith.constant 1 : index
    %c0_46 = arith.constant 0 : index
    %c0_47 = arith.constant 0 : index
    %68 = vector.load %arg4[%c1, %c0_46, %c0_47] : memref<16x6x18xf32, #tpu.memory_space<vmem>>, vector<1x6x16xf32>
    %69 = vector.shape_cast %68 : vector<1x6x16xf32> to vector<6x16xf32>
    %c1_48 = arith.constant 1 : index
    %c0_49 = arith.constant 0 : index
    %c16_50 = arith.constant 16 : index
    %70 = vector.load %arg4[%c1_48, %c0_49, %c16_50] : memref<16x6x18xf32, #tpu.memory_space<vmem>>, vector<1x6x1xf32>
    %71 = vector.shape_cast %70 : vector<1x6x1xf32> to vector<6x1xf32>
    %c1_51 = arith.constant 1 : index
    %c0_52 = arith.constant 0 : index
    %c17_53 = arith.constant 17 : index
    %72 = vector.load %arg4[%c1_51, %c0_52, %c17_53] : memref<16x6x18xf32, #tpu.memory_space<vmem>>, vector<1x6x1xf32>
    %73 = vector.shape_cast %72 : vector<1x6x1xf32> to vector<6x1xf32>
    %74 = arith.subf %53, %69 : vector<6x16xf32>
    %75 = arith.mulf %74, %74 : vector<6x16xf32>
    %cst_54 = arith.constant dense<0.000000e+00> : vector<6xf32>
    %76 = vector.multi_reduction <add>, %75, %cst_54 [1] : vector<6x16xf32> to vector<6xf32>
    %77 = vector.shape_cast %76 : vector<6xf32> to vector<6x1xf32>
    %78 = math.sqrt %77 : vector<6x1xf32>
    %79 = arith.addf %71, %78 : vector<6x1xf32>
    %80 = tpu.reciprocal %79 {approx = true} : vector<6x1xf32> -> vector<6x1xf32>
    %81 = arith.mulf %73, %80 : vector<6x1xf32>
    %82 = vector.broadcast %81 : vector<6x1xf32> to vector<6x16xf32>
    %83 = arith.mulf %82, %74 : vector<6x16xf32>
    %84 = arith.addf %53, %83 : vector<6x16xf32>
    %cst_55 = arith.constant 1.000000e+00 : f32
    %85 = vector.broadcast %cst_55 : f32 to vector<6x1xf32>
    %86 = arith.addf %85, %81 : vector<6x1xf32>
    %cst_56 = arith.constant 9.99999996E-13 : f32
    %87 = vector.broadcast %cst_56 : f32 to vector<6x1xf32>
    %88 = arith.maximumf %86, %87 : vector<6x1xf32>
    %89 = arith.mulf %58, %88 : vector<6x1xf32>
    %cst_57 = arith.constant 1.000000e+00 : f32
    %90 = vector.broadcast %cst_57 : f32 to vector<6x1xf32>
    %91 = arith.addf %90, %81 : vector<6x1xf32>
    %92 = arith.mulf %73, %80 : vector<6x1xf32>
    %93 = arith.mulf %92, %80 : vector<6x1xf32>
    %94 = arith.mulf %93, %78 : vector<6x1xf32>
    %95 = arith.subf %91, %94 : vector<6x1xf32>
    %cst_58 = arith.constant 9.99999996E-13 : f32
    %96 = vector.broadcast %cst_58 : f32 to vector<6x1xf32>
    %97 = arith.maximumf %95, %96 : vector<6x1xf32>
    %98 = arith.mulf %67, %97 : vector<6x1xf32>
    %c2 = arith.constant 2 : index
    %c0_59 = arith.constant 0 : index
    %c0_60 = arith.constant 0 : index
    %99 = vector.load %arg4[%c2, %c0_59, %c0_60] : memref<16x6x18xf32, #tpu.memory_space<vmem>>, vector<1x6x16xf32>
    %100 = vector.shape_cast %99 : vector<1x6x16xf32> to vector<6x16xf32>
    %c2_61 = arith.constant 2 : index
    %c0_62 = arith.constant 0 : index
    %c16_63 = arith.constant 16 : index
    %101 = vector.load %arg4[%c2_61, %c0_62, %c16_63] : memref<16x6x18xf32, #tpu.memory_space<vmem>>, vector<1x6x1xf32>
    %102 = vector.shape_cast %101 : vector<1x6x1xf32> to vector<6x1xf32>
    %c2_64 = arith.constant 2 : index
    %c0_65 = arith.constant 0 : index
    %c17_66 = arith.constant 17 : index
    %103 = vector.load %arg4[%c2_64, %c0_65, %c17_66] : memref<16x6x18xf32, #tpu.memory_space<vmem>>, vector<1x6x1xf32>
    %104 = vector.shape_cast %103 : vector<1x6x1xf32> to vector<6x1xf32>
    %105 = arith.subf %84, %100 : vector<6x16xf32>
    %106 = arith.mulf %105, %105 : vector<6x16xf32>
    %cst_67 = arith.constant dense<0.000000e+00> : vector<6xf32>
    %107 = vector.multi_reduction <add>, %106, %cst_67 [1] : vector<6x16xf32> to vector<6xf32>
    %108 = vector.shape_cast %107 : vector<6xf32> to vector<6x1xf32>
    %109 = math.sqrt %108 : vector<6x1xf32>
    %110 = arith.addf %102, %109 : vector<6x1xf32>
    %111 = tpu.reciprocal %110 {approx = true} : vector<6x1xf32> -> vector<6x1xf32>
    %112 = arith.mulf %104, %111 : vector<6x1xf32>
    %113 = vector.broadcast %112 : vector<6x1xf32> to vector<6x16xf32>
    %114 = arith.mulf %113, %105 : vector<6x16xf32>
    %115 = arith.addf %84, %114 : vector<6x16xf32>
    %cst_68 = arith.constant 1.000000e+00 : f32
    %116 = vector.broadcast %cst_68 : f32 to vector<6x1xf32>
    %117 = arith.addf %116, %112 : vector<6x1xf32>
    %cst_69 = arith.constant 9.99999996E-13 : f32
    %118 = vector.broadcast %cst_69 : f32 to vector<6x1xf32>
    %119 = arith.maximumf %117, %118 : vector<6x1xf32>
    %120 = arith.mulf %89, %119 : vector<6x1xf32>
    %cst_70 = arith.constant 1.000000e+00 : f32
    %121 = vector.broadcast %cst_70 : f32 to vector<6x1xf32>
    %122 = arith.addf %121, %112 : vector<6x1xf32>
    %123 = arith.mulf %104, %111 : vector<6x1xf32>
    %124 = arith.mulf %123, %111 : vector<6x1xf32>
    %125 = arith.mulf %124, %109 : vector<6x1xf32>
    %126 = arith.subf %122, %125 : vector<6x1xf32>
    %cst_71 = arith.constant 9.99999996E-13 : f32
    %127 = vector.broadcast %cst_71 : f32 to vector<6x1xf32>
    %128 = arith.maximumf %126, %127 : vector<6x1xf32>
    %129 = arith.mulf %98, %128 : vector<6x1xf32>
    %c3 = arith.constant 3 : index
    %c0_72 = arith.constant 0 : index
    %c0_73 = arith.constant 0 : index
    %130 = vector.load %arg4[%c3, %c0_72, %c0_73] : memref<16x6x18xf32, #tpu.memory_space<vmem>>, vector<1x6x16xf32>
    %131 = vector.shape_cast %130 : vector<1x6x16xf32> to vector<6x16xf32>
    %c3_74 = arith.constant 3 : index
    %c0_75 = arith.constant 0 : index
    %c16_76 = arith.constant 16 : index
    %132 = vector.load %arg4[%c3_74, %c0_75, %c16_76] : memref<16x6x18xf32, #tpu.memory_space<vmem>>, vector<1x6x1xf32>
    %133 = vector.shape_cast %132 : vector<1x6x1xf32> to vector<6x1xf32>
    %c3_77 = arith.constant 3 : index
    %c0_78 = arith.constant 0 : index
    %c17_79 = arith.constant 17 : index
    %134 = vector.load %arg4[%c3_77, %c0_78, %c17_79] : memref<16x6x18xf32, #tpu.memory_space<vmem>>, vector<1x6x1xf32>
    %135 = vector.shape_cast %134 : vector<1x6x1xf32> to vector<6x1xf32>
    %136 = arith.subf %115, %131 : vector<6x16xf32>
    %137 = arith.mulf %136, %136 : vector<6x16xf32>
    %cst_80 = arith.constant dense<0.000000e+00> : vector<6xf32>
    %138 = vector.multi_reduction <add>, %137, %cst_80 [1] : vector<6x16xf32> to vector<6xf32>
    %139 = vector.shape_cast %138 : vector<6xf32> to vector<6x1xf32>
    %140 = math.sqrt %139 : vector<6x1xf32>
    %141 = arith.addf %133, %140 : vector<6x1xf32>
    %142 = tpu.reciprocal %141 {approx = true} : vector<6x1xf32> -> vector<6x1xf32>
    %143 = arith.mulf %135, %142 : vector<6x1xf32>
    %144 = vector.broadcast %143 : vector<6x1xf32> to vector<6x16xf32>
    %145 = arith.mulf %144, %136 : vector<6x16xf32>
    %146 = arith.addf %115, %145 : vector<6x16xf32>
    %cst_81 = arith.constant 1.000000e+00 : f32
    %147 = vector.broadcast %cst_81 : f32 to vector<6x1xf32>
    %148 = arith.addf %147, %143 : vector<6x1xf32>
    %cst_82 = arith.constant 9.99999996E-13 : f32
    %149 = vector.broadcast %cst_82 : f32 to vector<6x1xf32>
    %150 = arith.maximumf %148, %149 : vector<6x1xf32>
    %151 = arith.mulf %120, %150 : vector<6x1xf32>
    %cst_83 = arith.constant 1.000000e+00 : f32
    %152 = vector.broadcast %cst_83 : f32 to vector<6x1xf32>
    %153 = arith.addf %152, %143 : vector<6x1xf32>
    %154 = arith.mulf %135, %142 : vector<6x1xf32>
    %155 = arith.mulf %154, %142 : vector<6x1xf32>
    %156 = arith.mulf %155, %140 : vector<6x1xf32>
    %157 = arith.subf %153, %156 : vector<6x1xf32>
    %cst_84 = arith.constant 9.99999996E-13 : f32
    %158 = vector.broadcast %cst_84 : f32 to vector<6x1xf32>
    %159 = arith.maximumf %157, %158 : vector<6x1xf32>
    %160 = arith.mulf %129, %159 : vector<6x1xf32>
    %c4 = arith.constant 4 : index
    %c0_85 = arith.constant 0 : index
    %c0_86 = arith.constant 0 : index
    %161 = vector.load %arg4[%c4, %c0_85, %c0_86] : memref<16x6x18xf32, #tpu.memory_space<vmem>>, vector<1x6x16xf32>
    %162 = vector.shape_cast %161 : vector<1x6x16xf32> to vector<6x16xf32>
    %c4_87 = arith.constant 4 : index
    %c0_88 = arith.constant 0 : index
    %c16_89 = arith.constant 16 : index
    %163 = vector.load %arg4[%c4_87, %c0_88, %c16_89] : memref<16x6x18xf32, #tpu.memory_space<vmem>>, vector<1x6x1xf32>
    %164 = vector.shape_cast %163 : vector<1x6x1xf32> to vector<6x1xf32>
    %c4_90 = arith.constant 4 : index
    %c0_91 = arith.constant 0 : index
    %c17_92 = arith.constant 17 : index
    %165 = vector.load %arg4[%c4_90, %c0_91, %c17_92] : memref<16x6x18xf32, #tpu.memory_space<vmem>>, vector<1x6x1xf32>
    %166 = vector.shape_cast %165 : vector<1x6x1xf32> to vector<6x1xf32>
    %167 = arith.subf %146, %162 : vector<6x16xf32>
    %168 = arith.mulf %167, %167 : vector<6x16xf32>
    %cst_93 = arith.constant dense<0.000000e+00> : vector<6xf32>
    %169 = vector.multi_reduction <add>, %168, %cst_93 [1] : vector<6x16xf32> to vector<6xf32>
    %170 = vector.shape_cast %169 : vector<6xf32> to vector<6x1xf32>
    %171 = math.sqrt %170 : vector<6x1xf32>
    %172 = arith.addf %164, %171 : vector<6x1xf32>
    %173 = tpu.reciprocal %172 {approx = true} : vector<6x1xf32> -> vector<6x1xf32>
    %174 = arith.mulf %166, %173 : vector<6x1xf32>
    %175 = vector.broadcast %174 : vector<6x1xf32> to vector<6x16xf32>
    %176 = arith.mulf %175, %167 : vector<6x16xf32>
    %177 = arith.addf %146, %176 : vector<6x16xf32>
    %cst_94 = arith.constant 1.000000e+00 : f32
    %178 = vector.broadcast %cst_94 : f32 to vector<6x1xf32>
    %179 = arith.addf %178, %174 : vector<6x1xf32>
    %cst_95 = arith.constant 9.99999996E-13 : f32
    %180 = vector.broadcast %cst_95 : f32 to vector<6x1xf32>
    %181 = arith.maximumf %179, %180 : vector<6x1xf32>
    %182 = arith.mulf %151, %181 : vector<6x1xf32>
    %cst_96 = arith.constant 1.000000e+00 : f32
    %183 = vector.broadcast %cst_96 : f32 to vector<6x1xf32>
    %184 = arith.addf %183, %174 : vector<6x1xf32>
    %185 = arith.mulf %166, %173 : vector<6x1xf32>
    %186 = arith.mulf %185, %173 : vector<6x1xf32>
    %187 = arith.mulf %186, %171 : vector<6x1xf32>
    %188 = arith.subf %184, %187 : vector<6x1xf32>
    %cst_97 = arith.constant 9.99999996E-13 : f32
    %189 = vector.broadcast %cst_97 : f32 to vector<6x1xf32>
    %190 = arith.maximumf %188, %189 : vector<6x1xf32>
    %191 = arith.mulf %160, %190 : vector<6x1xf32>
    %c5 = arith.constant 5 : index
    %c0_98 = arith.constant 0 : index
    %c0_99 = arith.constant 0 : index
    %192 = vector.load %arg4[%c5, %c0_98, %c0_99] : memref<16x6x18xf32, #tpu.memory_space<vmem>>, vector<1x6x16xf32>
    %193 = vector.shape_cast %192 : vector<1x6x16xf32> to vector<6x16xf32>
    %c5_100 = arith.constant 5 : index
    %c0_101 = arith.constant 0 : index
    %c16_102 = arith.constant 16 : index
    %194 = vector.load %arg4[%c5_100, %c0_101, %c16_102] : memref<16x6x18xf32, #tpu.memory_space<vmem>>, vector<1x6x1xf32>
    %195 = vector.shape_cast %194 : vector<1x6x1xf32> to vector<6x1xf32>
    %c5_103 = arith.constant 5 : index
    %c0_104 = arith.constant 0 : index
    %c17_105 = arith.constant 17 : index
    %196 = vector.load %arg4[%c5_103, %c0_104, %c17_105] : memref<16x6x18xf32, #tpu.memory_space<vmem>>, vector<1x6x1xf32>
    %197 = vector.shape_cast %196 : vector<1x6x1xf32> to vector<6x1xf32>
    %198 = arith.subf %177, %193 : vector<6x16xf32>
    %199 = arith.mulf %198, %198 : vector<6x16xf32>
    %cst_106 = arith.constant dense<0.000000e+00> : vector<6xf32>
    %200 = vector.multi_reduction <add>, %199, %cst_106 [1] : vector<6x16xf32> to vector<6xf32>
    %201 = vector.shape_cast %200 : vector<6xf32> to vector<6x1xf32>
    %202 = math.sqrt %201 : vector<6x1xf32>
    %203 = arith.addf %195, %202 : vector<6x1xf32>
    %204 = tpu.reciprocal %203 {approx = true} : vector<6x1xf32> -> vector<6x1xf32>
    %205 = arith.mulf %197, %204 : vector<6x1xf32>
    %206 = vector.broadcast %205 : vector<6x1xf32> to vector<6x16xf32>
    %207 = arith.mulf %206, %198 : vector<6x16xf32>
    %208 = arith.addf %177, %207 : vector<6x16xf32>
    %cst_107 = arith.constant 1.000000e+00 : f32
    %209 = vector.broadcast %cst_107 : f32 to vector<6x1xf32>
    %210 = arith.addf %209, %205 : vector<6x1xf32>
    %cst_108 = arith.constant 9.99999996E-13 : f32
    %211 = vector.broadcast %cst_108 : f32 to vector<6x1xf32>
    %212 = arith.maximumf %210, %211 : vector<6x1xf32>
    %213 = arith.mulf %182, %212 : vector<6x1xf32>
    %cst_109 = arith.constant 1.000000e+00 : f32
    %214 = vector.broadcast %cst_109 : f32 to vector<6x1xf32>
    %215 = arith.addf %214, %205 : vector<6x1xf32>
    %216 = arith.mulf %197, %204 : vector<6x1xf32>
    %217 = arith.mulf %216, %204 : vector<6x1xf32>
    %218 = arith.mulf %217, %202 : vector<6x1xf32>
    %219 = arith.subf %215, %218 : vector<6x1xf32>
    %cst_110 = arith.constant 9.99999996E-13 : f32
    %220 = vector.broadcast %cst_110 : f32 to vector<6x1xf32>
    %221 = arith.maximumf %219, %220 : vector<6x1xf32>
    %222 = arith.mulf %191, %221 : vector<6x1xf32>
    %c6 = arith.constant 6 : index
    %c0_111 = arith.constant 0 : index
    %c0_112 = arith.constant 0 : index
    %223 = vector.load %arg4[%c6, %c0_111, %c0_112] : memref<16x6x18xf32, #tpu.memory_space<vmem>>, vector<1x6x16xf32>
    %224 = vector.shape_cast %223 : vector<1x6x16xf32> to vector<6x16xf32>
    %c6_113 = arith.constant 6 : index
    %c0_114 = arith.constant 0 : index
    %c16_115 = arith.constant 16 : index
    %225 = vector.load %arg4[%c6_113, %c0_114, %c16_115] : memref<16x6x18xf32, #tpu.memory_space<vmem>>, vector<1x6x1xf32>
    %226 = vector.shape_cast %225 : vector<1x6x1xf32> to vector<6x1xf32>
    %c6_116 = arith.constant 6 : index
    %c0_117 = arith.constant 0 : index
    %c17_118 = arith.constant 17 : index
    %227 = vector.load %arg4[%c6_116, %c0_117, %c17_118] : memref<16x6x18xf32, #tpu.memory_space<vmem>>, vector<1x6x1xf32>
    %228 = vector.shape_cast %227 : vector<1x6x1xf32> to vector<6x1xf32>
    %229 = arith.subf %208, %224 : vector<6x16xf32>
    %230 = arith.mulf %229, %229 : vector<6x16xf32>
    %cst_119 = arith.constant dense<0.000000e+00> : vector<6xf32>
    %231 = vector.multi_reduction <add>, %230, %cst_119 [1] : vector<6x16xf32> to vector<6xf32>
    %232 = vector.shape_cast %231 : vector<6xf32> to vector<6x1xf32>
    %233 = math.sqrt %232 : vector<6x1xf32>
    %234 = arith.addf %226, %233 : vector<6x1xf32>
    %235 = tpu.reciprocal %234 {approx = true} : vector<6x1xf32> -> vector<6x1xf32>
    %236 = arith.mulf %228, %235 : vector<6x1xf32>
    %237 = vector.broadcast %236 : vector<6x1xf32> to vector<6x16xf32>
    %238 = arith.mulf %237, %229 : vector<6x16xf32>
    %239 = arith.addf %208, %238 : vector<6x16xf32>
    %cst_120 = arith.constant 1.000000e+00 : f32
    %240 = vector.broadcast %cst_120 : f32 to vector<6x1xf32>
    %241 = arith.addf %240, %236 : vector<6x1xf32>
    %cst_121 = arith.constant 9.99999996E-13 : f32
    %242 = vector.broadcast %cst_121 : f32 to vector<6x1xf32>
    %243 = arith.maximumf %241, %242 : vector<6x1xf32>
    %244 = arith.mulf %213, %243 : vector<6x1xf32>
    %cst_122 = arith.constant 1.000000e+00 : f32
    %245 = vector.broadcast %cst_122 : f32 to vector<6x1xf32>
    %246 = arith.addf %245, %236 : vector<6x1xf32>
    %247 = arith.mulf %228, %235 : vector<6x1xf32>
    %248 = arith.mulf %247, %235 : vector<6x1xf32>
    %249 = arith.mulf %248, %233 : vector<6x1xf32>
    %250 = arith.subf %246, %249 : vector<6x1xf32>
    %cst_123 = arith.constant 9.99999996E-13 : f32
    %251 = vector.broadcast %cst_123 : f32 to vector<6x1xf32>
    %252 = arith.maximumf %250, %251 : vector<6x1xf32>
    %253 = arith.mulf %222, %252 : vector<6x1xf32>
    %c7 = arith.constant 7 : index
    %c0_124 = arith.constant 0 : index
    %c0_125 = arith.constant 0 : index
    %254 = vector.load %arg4[%c7, %c0_124, %c0_125] : memref<16x6x18xf32, #tpu.memory_space<vmem>>, vector<1x6x16xf32>
    %255 = vector.shape_cast %254 : vector<1x6x16xf32> to vector<6x16xf32>
    %c7_126 = arith.constant 7 : index
    %c0_127 = arith.constant 0 : index
    %c16_128 = arith.constant 16 : index
    %256 = vector.load %arg4[%c7_126, %c0_127, %c16_128] : memref<16x6x18xf32, #tpu.memory_space<vmem>>, vector<1x6x1xf32>
    %257 = vector.shape_cast %256 : vector<1x6x1xf32> to vector<6x1xf32>
    %c7_129 = arith.constant 7 : index
    %c0_130 = arith.constant 0 : index
    %c17_131 = arith.constant 17 : index
    %258 = vector.load %arg4[%c7_129, %c0_130, %c17_131] : memref<16x6x18xf32, #tpu.memory_space<vmem>>, vector<1x6x1xf32>
    %259 = vector.shape_cast %258 : vector<1x6x1xf32> to vector<6x1xf32>
    %260 = arith.subf %239, %255 : vector<6x16xf32>
    %261 = arith.mulf %260, %260 : vector<6x16xf32>
    %cst_132 = arith.constant dense<0.000000e+00> : vector<6xf32>
    %262 = vector.multi_reduction <add>, %261, %cst_132 [1] : vector<6x16xf32> to vector<6xf32>
    %263 = vector.shape_cast %262 : vector<6xf32> to vector<6x1xf32>
    %264 = math.sqrt %263 : vector<6x1xf32>
    %265 = arith.addf %257, %264 : vector<6x1xf32>
    %266 = tpu.reciprocal %265 {approx = true} : vector<6x1xf32> -> vector<6x1xf32>
    %267 = arith.mulf %259, %266 : vector<6x1xf32>
    %268 = vector.broadcast %267 : vector<6x1xf32> to vector<6x16xf32>
    %269 = arith.mulf %268, %260 : vector<6x16xf32>
    %270 = arith.addf %239, %269 : vector<6x16xf32>
    %cst_133 = arith.constant 1.000000e+00 : f32
    %271 = vector.broadcast %cst_133 : f32 to vector<6x1xf32>
    %272 = arith.addf %271, %267 : vector<6x1xf32>
    %cst_134 = arith.constant 9.99999996E-13 : f32
    %273 = vector.broadcast %cst_134 : f32 to vector<6x1xf32>
    %274 = arith.maximumf %272, %273 : vector<6x1xf32>
    %275 = arith.mulf %244, %274 : vector<6x1xf32>
    %cst_135 = arith.constant 1.000000e+00 : f32
    %276 = vector.broadcast %cst_135 : f32 to vector<6x1xf32>
    %277 = arith.addf %276, %267 : vector<6x1xf32>
    %278 = arith.mulf %259, %266 : vector<6x1xf32>
    %279 = arith.mulf %278, %266 : vector<6x1xf32>
    %280 = arith.mulf %279, %264 : vector<6x1xf32>
    %281 = arith.subf %277, %280 : vector<6x1xf32>
    %cst_136 = arith.constant 9.99999996E-13 : f32
    %282 = vector.broadcast %cst_136 : f32 to vector<6x1xf32>
    %283 = arith.maximumf %281, %282 : vector<6x1xf32>
    %284 = arith.mulf %253, %283 : vector<6x1xf32>
    %cst_137 = arith.constant 1.000000e-30 : f32
    %285 = vector.broadcast %cst_137 : f32 to vector<6x1xf32>
    %286 = arith.maximumf %275, %285 : vector<6x1xf32>
    %287 = math.log %286 : vector<6x1xf32>
    %cst_138 = arith.constant 1.500000e+01 : f32
    %288 = vector.broadcast %cst_138 : f32 to vector<6x1xf32>
    %289 = arith.mulf %288, %287 : vector<6x1xf32>
    %290 = arith.addf %34, %289 : vector<6x1xf32>
    %cst_139 = arith.constant 1.000000e-30 : f32
    %291 = vector.broadcast %cst_139 : f32 to vector<6x1xf32>
    %292 = arith.maximumf %284, %291 : vector<6x1xf32>
    %293 = math.log %292 : vector<6x1xf32>
    %294 = arith.addf %290, %293 : vector<6x1xf32>
    %cst_140 = arith.constant 1.000000e+00 : f32
    %295 = vector.broadcast %cst_140 : f32 to vector<6x1xf32>
    %cst_141 = arith.constant 1.000000e+00 : f32
    %296 = vector.broadcast %cst_141 : f32 to vector<6x1xf32>
    %c8 = arith.constant 8 : index
    %c0_142 = arith.constant 0 : index
    %c0_143 = arith.constant 0 : index
    %297 = vector.load %arg4[%c8, %c0_142, %c0_143] : memref<16x6x18xf32, #tpu.memory_space<vmem>>, vector<1x6x16xf32>
    %298 = vector.shape_cast %297 : vector<1x6x16xf32> to vector<6x16xf32>
    %c8_144 = arith.constant 8 : index
    %c0_145 = arith.constant 0 : index
    %c16_146 = arith.constant 16 : index
    %299 = vector.load %arg4[%c8_144, %c0_145, %c16_146] : memref<16x6x18xf32, #tpu.memory_space<vmem>>, vector<1x6x1xf32>
    %300 = vector.shape_cast %299 : vector<1x6x1xf32> to vector<6x1xf32>
    %c8_147 = arith.constant 8 : index
    %c0_148 = arith.constant 0 : index
    %c17_149 = arith.constant 17 : index
    %301 = vector.load %arg4[%c8_147, %c0_148, %c17_149] : memref<16x6x18xf32, #tpu.memory_space<vmem>>, vector<1x6x1xf32>
    %302 = vector.shape_cast %301 : vector<1x6x1xf32> to vector<6x1xf32>
    %303 = arith.subf %270, %298 : vector<6x16xf32>
    %304 = arith.mulf %303, %303 : vector<6x16xf32>
    %cst_150 = arith.constant dense<0.000000e+00> : vector<6xf32>
    %305 = vector.multi_reduction <add>, %304, %cst_150 [1] : vector<6x16xf32> to vector<6xf32>
    %306 = vector.shape_cast %305 : vector<6xf32> to vector<6x1xf32>
    %307 = math.sqrt %306 : vector<6x1xf32>
    %308 = arith.addf %300, %307 : vector<6x1xf32>
    %309 = tpu.reciprocal %308 {approx = true} : vector<6x1xf32> -> vector<6x1xf32>
    %310 = arith.mulf %302, %309 : vector<6x1xf32>
    %311 = vector.broadcast %310 : vector<6x1xf32> to vector<6x16xf32>
    %312 = arith.mulf %311, %303 : vector<6x16xf32>
    %313 = arith.addf %270, %312 : vector<6x16xf32>
    %cst_151 = arith.constant 1.000000e+00 : f32
    %314 = vector.broadcast %cst_151 : f32 to vector<6x1xf32>
    %315 = arith.addf %314, %310 : vector<6x1xf32>
    %cst_152 = arith.constant 9.99999996E-13 : f32
    %316 = vector.broadcast %cst_152 : f32 to vector<6x1xf32>
    %317 = arith.maximumf %315, %316 : vector<6x1xf32>
    %318 = arith.mulf %295, %317 : vector<6x1xf32>
    %cst_153 = arith.constant 1.000000e+00 : f32
    %319 = vector.broadcast %cst_153 : f32 to vector<6x1xf32>
    %320 = arith.addf %319, %310 : vector<6x1xf32>
    %321 = arith.mulf %302, %309 : vector<6x1xf32>
    %322 = arith.mulf %321, %309 : vector<6x1xf32>
    %323 = arith.mulf %322, %307 : vector<6x1xf32>
    %324 = arith.subf %320, %323 : vector<6x1xf32>
    %cst_154 = arith.constant 9.99999996E-13 : f32
    %325 = vector.broadcast %cst_154 : f32 to vector<6x1xf32>
    %326 = arith.maximumf %324, %325 : vector<6x1xf32>
    %327 = arith.mulf %296, %326 : vector<6x1xf32>
    %c9 = arith.constant 9 : index
    %c0_155 = arith.constant 0 : index
    %c0_156 = arith.constant 0 : index
    %328 = vector.load %arg4[%c9, %c0_155, %c0_156] : memref<16x6x18xf32, #tpu.memory_space<vmem>>, vector<1x6x16xf32>
    %329 = vector.shape_cast %328 : vector<1x6x16xf32> to vector<6x16xf32>
    %c9_157 = arith.constant 9 : index
    %c0_158 = arith.constant 0 : index
    %c16_159 = arith.constant 16 : index
    %330 = vector.load %arg4[%c9_157, %c0_158, %c16_159] : memref<16x6x18xf32, #tpu.memory_space<vmem>>, vector<1x6x1xf32>
    %331 = vector.shape_cast %330 : vector<1x6x1xf32> to vector<6x1xf32>
    %c9_160 = arith.constant 9 : index
    %c0_161 = arith.constant 0 : index
    %c17_162 = arith.constant 17 : index
    %332 = vector.load %arg4[%c9_160, %c0_161, %c17_162] : memref<16x6x18xf32, #tpu.memory_space<vmem>>, vector<1x6x1xf32>
    %333 = vector.shape_cast %332 : vector<1x6x1xf32> to vector<6x1xf32>
    %334 = arith.subf %313, %329 : vector<6x16xf32>
    %335 = arith.mulf %334, %334 : vector<6x16xf32>
    %cst_163 = arith.constant dense<0.000000e+00> : vector<6xf32>
    %336 = vector.multi_reduction <add>, %335, %cst_163 [1] : vector<6x16xf32> to vector<6xf32>
    %337 = vector.shape_cast %336 : vector<6xf32> to vector<6x1xf32>
    %338 = math.sqrt %337 : vector<6x1xf32>
    %339 = arith.addf %331, %338 : vector<6x1xf32>
    %340 = tpu.reciprocal %339 {approx = true} : vector<6x1xf32> -> vector<6x1xf32>
    %341 = arith.mulf %333, %340 : vector<6x1xf32>
    %342 = vector.broadcast %341 : vector<6x1xf32> to vector<6x16xf32>
    %343 = arith.mulf %342, %334 : vector<6x16xf32>
    %344 = arith.addf %313, %343 : vector<6x16xf32>
    %cst_164 = arith.constant 1.000000e+00 : f32
    %345 = vector.broadcast %cst_164 : f32 to vector<6x1xf32>
    %346 = arith.addf %345, %341 : vector<6x1xf32>
    %cst_165 = arith.constant 9.99999996E-13 : f32
    %347 = vector.broadcast %cst_165 : f32 to vector<6x1xf32>
    %348 = arith.maximumf %346, %347 : vector<6x1xf32>
    %349 = arith.mulf %318, %348 : vector<6x1xf32>
    %cst_166 = arith.constant 1.000000e+00 : f32
    %350 = vector.broadcast %cst_166 : f32 to vector<6x1xf32>
    %351 = arith.addf %350, %341 : vector<6x1xf32>
    %352 = arith.mulf %333, %340 : vector<6x1xf32>
    %353 = arith.mulf %352, %340 : vector<6x1xf32>
    %354 = arith.mulf %353, %338 : vector<6x1xf32>
    %355 = arith.subf %351, %354 : vector<6x1xf32>
    %cst_167 = arith.constant 9.99999996E-13 : f32
    %356 = vector.broadcast %cst_167 : f32 to vector<6x1xf32>
    %357 = arith.maximumf %355, %356 : vector<6x1xf32>
    %358 = arith.mulf %327, %357 : vector<6x1xf32>
    %c10 = arith.constant 10 : index
    %c0_168 = arith.constant 0 : index
    %c0_169 = arith.constant 0 : index
    %359 = vector.load %arg4[%c10, %c0_168, %c0_169] : memref<16x6x18xf32, #tpu.memory_space<vmem>>, vector<1x6x16xf32>
    %360 = vector.shape_cast %359 : vector<1x6x16xf32> to vector<6x16xf32>
    %c10_170 = arith.constant 10 : index
    %c0_171 = arith.constant 0 : index
    %c16_172 = arith.constant 16 : index
    %361 = vector.load %arg4[%c10_170, %c0_171, %c16_172] : memref<16x6x18xf32, #tpu.memory_space<vmem>>, vector<1x6x1xf32>
    %362 = vector.shape_cast %361 : vector<1x6x1xf32> to vector<6x1xf32>
    %c10_173 = arith.constant 10 : index
    %c0_174 = arith.constant 0 : index
    %c17_175 = arith.constant 17 : index
    %363 = vector.load %arg4[%c10_173, %c0_174, %c17_175] : memref<16x6x18xf32, #tpu.memory_space<vmem>>, vector<1x6x1xf32>
    %364 = vector.shape_cast %363 : vector<1x6x1xf32> to vector<6x1xf32>
    %365 = arith.subf %344, %360 : vector<6x16xf32>
    %366 = arith.mulf %365, %365 : vector<6x16xf32>
    %cst_176 = arith.constant dense<0.000000e+00> : vector<6xf32>
    %367 = vector.multi_reduction <add>, %366, %cst_176 [1] : vector<6x16xf32> to vector<6xf32>
    %368 = vector.shape_cast %367 : vector<6xf32> to vector<6x1xf32>
    %369 = math.sqrt %368 : vector<6x1xf32>
    %370 = arith.addf %362, %369 : vector<6x1xf32>
    %371 = tpu.reciprocal %370 {approx = true} : vector<6x1xf32> -> vector<6x1xf32>
    %372 = arith.mulf %364, %371 : vector<6x1xf32>
    %373 = vector.broadcast %372 : vector<6x1xf32> to vector<6x16xf32>
    %374 = arith.mulf %373, %365 : vector<6x16xf32>
    %375 = arith.addf %344, %374 : vector<6x16xf32>
    %cst_177 = arith.constant 1.000000e+00 : f32
    %376 = vector.broadcast %cst_177 : f32 to vector<6x1xf32>
    %377 = arith.addf %376, %372 : vector<6x1xf32>
    %cst_178 = arith.constant 9.99999996E-13 : f32
    %378 = vector.broadcast %cst_178 : f32 to vector<6x1xf32>
    %379 = arith.maximumf %377, %378 : vector<6x1xf32>
    %380 = arith.mulf %349, %379 : vector<6x1xf32>
    %cst_179 = arith.constant 1.000000e+00 : f32
    %381 = vector.broadcast %cst_179 : f32 to vector<6x1xf32>
    %382 = arith.addf %381, %372 : vector<6x1xf32>
    %383 = arith.mulf %364, %371 : vector<6x1xf32>
    %384 = arith.mulf %383, %371 : vector<6x1xf32>
    %385 = arith.mulf %384, %369 : vector<6x1xf32>
    %386 = arith.subf %382, %385 : vector<6x1xf32>
    %cst_180 = arith.constant 9.99999996E-13 : f32
    %387 = vector.broadcast %cst_180 : f32 to vector<6x1xf32>
    %388 = arith.maximumf %386, %387 : vector<6x1xf32>
    %389 = arith.mulf %358, %388 : vector<6x1xf32>
    %c11 = arith.constant 11 : index
    %c0_181 = arith.constant 0 : index
    %c0_182 = arith.constant 0 : index
    %390 = vector.load %arg4[%c11, %c0_181, %c0_182] : memref<16x6x18xf32, #tpu.memory_space<vmem>>, vector<1x6x16xf32>
    %391 = vector.shape_cast %390 : vector<1x6x16xf32> to vector<6x16xf32>
    %c11_183 = arith.constant 11 : index
    %c0_184 = arith.constant 0 : index
    %c16_185 = arith.constant 16 : index
    %392 = vector.load %arg4[%c11_183, %c0_184, %c16_185] : memref<16x6x18xf32, #tpu.memory_space<vmem>>, vector<1x6x1xf32>
    %393 = vector.shape_cast %392 : vector<1x6x1xf32> to vector<6x1xf32>
    %c11_186 = arith.constant 11 : index
    %c0_187 = arith.constant 0 : index
    %c17_188 = arith.constant 17 : index
    %394 = vector.load %arg4[%c11_186, %c0_187, %c17_188] : memref<16x6x18xf32, #tpu.memory_space<vmem>>, vector<1x6x1xf32>
    %395 = vector.shape_cast %394 : vector<1x6x1xf32> to vector<6x1xf32>
    %396 = arith.subf %375, %391 : vector<6x16xf32>
    %397 = arith.mulf %396, %396 : vector<6x16xf32>
    %cst_189 = arith.constant dense<0.000000e+00> : vector<6xf32>
    %398 = vector.multi_reduction <add>, %397, %cst_189 [1] : vector<6x16xf32> to vector<6xf32>
    %399 = vector.shape_cast %398 : vector<6xf32> to vector<6x1xf32>
    %400 = math.sqrt %399 : vector<6x1xf32>
    %401 = arith.addf %393, %400 : vector<6x1xf32>
    %402 = tpu.reciprocal %401 {approx = true} : vector<6x1xf32> -> vector<6x1xf32>
    %403 = arith.mulf %395, %402 : vector<6x1xf32>
    %404 = vector.broadcast %403 : vector<6x1xf32> to vector<6x16xf32>
    %405 = arith.mulf %404, %396 : vector<6x16xf32>
    %406 = arith.addf %375, %405 : vector<6x16xf32>
    %cst_190 = arith.constant 1.000000e+00 : f32
    %407 = vector.broadcast %cst_190 : f32 to vector<6x1xf32>
    %408 = arith.addf %407, %403 : vector<6x1xf32>
    %cst_191 = arith.constant 9.99999996E-13 : f32
    %409 = vector.broadcast %cst_191 : f32 to vector<6x1xf32>
    %410 = arith.maximumf %408, %409 : vector<6x1xf32>
    %411 = arith.mulf %380, %410 : vector<6x1xf32>
    %cst_192 = arith.constant 1.000000e+00 : f32
    %412 = vector.broadcast %cst_192 : f32 to vector<6x1xf32>
    %413 = arith.addf %412, %403 : vector<6x1xf32>
    %414 = arith.mulf %395, %402 : vector<6x1xf32>
    %415 = arith.mulf %414, %402 : vector<6x1xf32>
    %416 = arith.mulf %415, %400 : vector<6x1xf32>
    %417 = arith.subf %413, %416 : vector<6x1xf32>
    %cst_193 = arith.constant 9.99999996E-13 : f32
    %418 = vector.broadcast %cst_193 : f32 to vector<6x1xf32>
    %419 = arith.maximumf %417, %418 : vector<6x1xf32>
    %420 = arith.mulf %389, %419 : vector<6x1xf32>
    %c12 = arith.constant 12 : index
    %c0_194 = arith.constant 0 : index
    %c0_195 = arith.constant 0 : index
    %421 = vector.load %arg4[%c12, %c0_194, %c0_195] : memref<16x6x18xf32, #tpu.memory_space<vmem>>, vector<1x6x16xf32>
    %422 = vector.shape_cast %421 : vector<1x6x16xf32> to vector<6x16xf32>
    %c12_196 = arith.constant 12 : index
    %c0_197 = arith.constant 0 : index
    %c16_198 = arith.constant 16 : index
    %423 = vector.load %arg4[%c12_196, %c0_197, %c16_198] : memref<16x6x18xf32, #tpu.memory_space<vmem>>, vector<1x6x1xf32>
    %424 = vector.shape_cast %423 : vector<1x6x1xf32> to vector<6x1xf32>
    %c12_199 = arith.constant 12 : index
    %c0_200 = arith.constant 0 : index
    %c17_201 = arith.constant 17 : index
    %425 = vector.load %arg4[%c12_199, %c0_200, %c17_201] : memref<16x6x18xf32, #tpu.memory_space<vmem>>, vector<1x6x1xf32>
    %426 = vector.shape_cast %425 : vector<1x6x1xf32> to vector<6x1xf32>
    %427 = arith.subf %406, %422 : vector<6x16xf32>
    %428 = arith.mulf %427, %427 : vector<6x16xf32>
    %cst_202 = arith.constant dense<0.000000e+00> : vector<6xf32>
    %429 = vector.multi_reduction <add>, %428, %cst_202 [1] : vector<6x16xf32> to vector<6xf32>
    %430 = vector.shape_cast %429 : vector<6xf32> to vector<6x1xf32>
    %431 = math.sqrt %430 : vector<6x1xf32>
    %432 = arith.addf %424, %431 : vector<6x1xf32>
    %433 = tpu.reciprocal %432 {approx = true} : vector<6x1xf32> -> vector<6x1xf32>
    %434 = arith.mulf %426, %433 : vector<6x1xf32>
    %435 = vector.broadcast %434 : vector<6x1xf32> to vector<6x16xf32>
    %436 = arith.mulf %435, %427 : vector<6x16xf32>
    %437 = arith.addf %406, %436 : vector<6x16xf32>
    %cst_203 = arith.constant 1.000000e+00 : f32
    %438 = vector.broadcast %cst_203 : f32 to vector<6x1xf32>
    %439 = arith.addf %438, %434 : vector<6x1xf32>
    %cst_204 = arith.constant 9.99999996E-13 : f32
    %440 = vector.broadcast %cst_204 : f32 to vector<6x1xf32>
    %441 = arith.maximumf %439, %440 : vector<6x1xf32>
    %442 = arith.mulf %411, %441 : vector<6x1xf32>
    %cst_205 = arith.constant 1.000000e+00 : f32
    %443 = vector.broadcast %cst_205 : f32 to vector<6x1xf32>
    %444 = arith.addf %443, %434 : vector<6x1xf32>
    %445 = arith.mulf %426, %433 : vector<6x1xf32>
    %446 = arith.mulf %445, %433 : vector<6x1xf32>
    %447 = arith.mulf %446, %431 : vector<6x1xf32>
    %448 = arith.subf %444, %447 : vector<6x1xf32>
    %cst_206 = arith.constant 9.99999996E-13 : f32
    %449 = vector.broadcast %cst_206 : f32 to vector<6x1xf32>
    %450 = arith.maximumf %448, %449 : vector<6x1xf32>
    %451 = arith.mulf %420, %450 : vector<6x1xf32>
    %c13 = arith.constant 13 : index
    %c0_207 = arith.constant 0 : index
    %c0_208 = arith.constant 0 : index
    %452 = vector.load %arg4[%c13, %c0_207, %c0_208] : memref<16x6x18xf32, #tpu.memory_space<vmem>>, vector<1x6x16xf32>
    %453 = vector.shape_cast %452 : vector<1x6x16xf32> to vector<6x16xf32>
    %c13_209 = arith.constant 13 : index
    %c0_210 = arith.constant 0 : index
    %c16_211 = arith.constant 16 : index
    %454 = vector.load %arg4[%c13_209, %c0_210, %c16_211] : memref<16x6x18xf32, #tpu.memory_space<vmem>>, vector<1x6x1xf32>
    %455 = vector.shape_cast %454 : vector<1x6x1xf32> to vector<6x1xf32>
    %c13_212 = arith.constant 13 : index
    %c0_213 = arith.constant 0 : index
    %c17_214 = arith.constant 17 : index
    %456 = vector.load %arg4[%c13_212, %c0_213, %c17_214] : memref<16x6x18xf32, #tpu.memory_space<vmem>>, vector<1x6x1xf32>
    %457 = vector.shape_cast %456 : vector<1x6x1xf32> to vector<6x1xf32>
    %458 = arith.subf %437, %453 : vector<6x16xf32>
    %459 = arith.mulf %458, %458 : vector<6x16xf32>
    %cst_215 = arith.constant dense<0.000000e+00> : vector<6xf32>
    %460 = vector.multi_reduction <add>, %459, %cst_215 [1] : vector<6x16xf32> to vector<6xf32>
    %461 = vector.shape_cast %460 : vector<6xf32> to vector<6x1xf32>
    %462 = math.sqrt %461 : vector<6x1xf32>
    %463 = arith.addf %455, %462 : vector<6x1xf32>
    %464 = tpu.reciprocal %463 {approx = true} : vector<6x1xf32> -> vector<6x1xf32>
    %465 = arith.mulf %457, %464 : vector<6x1xf32>
    %466 = vector.broadcast %465 : vector<6x1xf32> to vector<6x16xf32>
    %467 = arith.mulf %466, %458 : vector<6x16xf32>
    %468 = arith.addf %437, %467 : vector<6x16xf32>
    %cst_216 = arith.constant 1.000000e+00 : f32
    %469 = vector.broadcast %cst_216 : f32 to vector<6x1xf32>
    %470 = arith.addf %469, %465 : vector<6x1xf32>
    %cst_217 = arith.constant 9.99999996E-13 : f32
    %471 = vector.broadcast %cst_217 : f32 to vector<6x1xf32>
    %472 = arith.maximumf %470, %471 : vector<6x1xf32>
    %473 = arith.mulf %442, %472 : vector<6x1xf32>
    %cst_218 = arith.constant 1.000000e+00 : f32
    %474 = vector.broadcast %cst_218 : f32 to vector<6x1xf32>
    %475 = arith.addf %474, %465 : vector<6x1xf32>
    %476 = arith.mulf %457, %464 : vector<6x1xf32>
    %477 = arith.mulf %476, %464 : vector<6x1xf32>
    %478 = arith.mulf %477, %462 : vector<6x1xf32>
    %479 = arith.subf %475, %478 : vector<6x1xf32>
    %cst_219 = arith.constant 9.99999996E-13 : f32
    %480 = vector.broadcast %cst_219 : f32 to vector<6x1xf32>
    %481 = arith.maximumf %479, %480 : vector<6x1xf32>
    %482 = arith.mulf %451, %481 : vector<6x1xf32>
    %c14 = arith.constant 14 : index
    %c0_220 = arith.constant 0 : index
    %c0_221 = arith.constant 0 : index
    %483 = vector.load %arg4[%c14, %c0_220, %c0_221] : memref<16x6x18xf32, #tpu.memory_space<vmem>>, vector<1x6x16xf32>
    %484 = vector.shape_cast %483 : vector<1x6x16xf32> to vector<6x16xf32>
    %c14_222 = arith.constant 14 : index
    %c0_223 = arith.constant 0 : index
    %c16_224 = arith.constant 16 : index
    %485 = vector.load %arg4[%c14_222, %c0_223, %c16_224] : memref<16x6x18xf32, #tpu.memory_space<vmem>>, vector<1x6x1xf32>
    %486 = vector.shape_cast %485 : vector<1x6x1xf32> to vector<6x1xf32>
    %c14_225 = arith.constant 14 : index
    %c0_226 = arith.constant 0 : index
    %c17_227 = arith.constant 17 : index
    %487 = vector.load %arg4[%c14_225, %c0_226, %c17_227] : memref<16x6x18xf32, #tpu.memory_space<vmem>>, vector<1x6x1xf32>
    %488 = vector.shape_cast %487 : vector<1x6x1xf32> to vector<6x1xf32>
    %489 = arith.subf %468, %484 : vector<6x16xf32>
    %490 = arith.mulf %489, %489 : vector<6x16xf32>
    %cst_228 = arith.constant dense<0.000000e+00> : vector<6xf32>
    %491 = vector.multi_reduction <add>, %490, %cst_228 [1] : vector<6x16xf32> to vector<6xf32>
    %492 = vector.shape_cast %491 : vector<6xf32> to vector<6x1xf32>
    %493 = math.sqrt %492 : vector<6x1xf32>
    %494 = arith.addf %486, %493 : vector<6x1xf32>
    %495 = tpu.reciprocal %494 {approx = true} : vector<6x1xf32> -> vector<6x1xf32>
    %496 = arith.mulf %488, %495 : vector<6x1xf32>
    %497 = vector.broadcast %496 : vector<6x1xf32> to vector<6x16xf32>
    %498 = arith.mulf %497, %489 : vector<6x16xf32>
    %499 = arith.addf %468, %498 : vector<6x16xf32>
    %cst_229 = arith.constant 1.000000e+00 : f32
    %500 = vector.broadcast %cst_229 : f32 to vector<6x1xf32>
    %501 = arith.addf %500, %496 : vector<6x1xf32>
    %cst_230 = arith.constant 9.99999996E-13 : f32
    %502 = vector.broadcast %cst_230 : f32 to vector<6x1xf32>
    %503 = arith.maximumf %501, %502 : vector<6x1xf32>
    %504 = arith.mulf %473, %503 : vector<6x1xf32>
    %cst_231 = arith.constant 1.000000e+00 : f32
    %505 = vector.broadcast %cst_231 : f32 to vector<6x1xf32>
    %506 = arith.addf %505, %496 : vector<6x1xf32>
    %507 = arith.mulf %488, %495 : vector<6x1xf32>
    %508 = arith.mulf %507, %495 : vector<6x1xf32>
    %509 = arith.mulf %508, %493 : vector<6x1xf32>
    %510 = arith.subf %506, %509 : vector<6x1xf32>
    %cst_232 = arith.constant 9.99999996E-13 : f32
    %511 = vector.broadcast %cst_232 : f32 to vector<6x1xf32>
    %512 = arith.maximumf %510, %511 : vector<6x1xf32>
    %513 = arith.mulf %482, %512 : vector<6x1xf32>
    %c15 = arith.constant 15 : index
    %c0_233 = arith.constant 0 : index
    %c0_234 = arith.constant 0 : index
    %514 = vector.load %arg4[%c15, %c0_233, %c0_234] : memref<16x6x18xf32, #tpu.memory_space<vmem>>, vector<1x6x16xf32>
    %515 = vector.shape_cast %514 : vector<1x6x16xf32> to vector<6x16xf32>
    %c15_235 = arith.constant 15 : index
    %c0_236 = arith.constant 0 : index
    %c16_237 = arith.constant 16 : index
    %516 = vector.load %arg4[%c15_235, %c0_236, %c16_237] : memref<16x6x18xf32, #tpu.memory_space<vmem>>, vector<1x6x1xf32>
    %517 = vector.shape_cast %516 : vector<1x6x1xf32> to vector<6x1xf32>
    %c15_238 = arith.constant 15 : index
    %c0_239 = arith.constant 0 : index
    %c17_240 = arith.constant 17 : index
    %518 = vector.load %arg4[%c15_238, %c0_239, %c17_240] : memref<16x6x18xf32, #tpu.memory_space<vmem>>, vector<1x6x1xf32>
    %519 = vector.shape_cast %518 : vector<1x6x1xf32> to vector<6x1xf32>
    %520 = arith.subf %499, %515 : vector<6x16xf32>
    %521 = arith.mulf %520, %520 : vector<6x16xf32>
    %cst_241 = arith.constant dense<0.000000e+00> : vector<6xf32>
    %522 = vector.multi_reduction <add>, %521, %cst_241 [1] : vector<6x16xf32> to vector<6xf32>
    %523 = vector.shape_cast %522 : vector<6xf32> to vector<6x1xf32>
    %524 = math.sqrt %523 : vector<6x1xf32>
    %525 = arith.addf %517, %524 : vector<6x1xf32>
    %526 = tpu.reciprocal %525 {approx = true} : vector<6x1xf32> -> vector<6x1xf32>
    %527 = arith.mulf %519, %526 : vector<6x1xf32>
    %528 = vector.broadcast %527 : vector<6x1xf32> to vector<6x16xf32>
    %529 = arith.mulf %528, %520 : vector<6x16xf32>
    %530 = arith.addf %499, %529 : vector<6x16xf32>
    %cst_242 = arith.constant 1.000000e+00 : f32
    %531 = vector.broadcast %cst_242 : f32 to vector<6x1xf32>
    %532 = arith.addf %531, %527 : vector<6x1xf32>
    %cst_243 = arith.constant 9.99999996E-13 : f32
    %533 = vector.broadcast %cst_243 : f32 to vector<6x1xf32>
    %534 = arith.maximumf %532, %533 : vector<6x1xf32>
    %535 = arith.mulf %504, %534 : vector<6x1xf32>
    %cst_244 = arith.constant 1.000000e+00 : f32
    %536 = vector.broadcast %cst_244 : f32 to vector<6x1xf32>
    %537 = arith.addf %536, %527 : vector<6x1xf32>
    %538 = arith.mulf %519, %526 : vector<6x1xf32>
    %539 = arith.mulf %538, %526 : vector<6x1xf32>
    %540 = arith.mulf %539, %524 : vector<6x1xf32>
    %541 = arith.subf %537, %540 : vector<6x1xf32>
    %cst_245 = arith.constant 9.99999996E-13 : f32
    %542 = vector.broadcast %cst_245 : f32 to vector<6x1xf32>
    %543 = arith.maximumf %541, %542 : vector<6x1xf32>
    %544 = arith.mulf %513, %543 : vector<6x1xf32>
    %cst_246 = arith.constant 1.000000e-30 : f32
    %545 = vector.broadcast %cst_246 : f32 to vector<6x1xf32>
    %546 = arith.maximumf %535, %545 : vector<6x1xf32>
    %547 = math.log %546 : vector<6x1xf32>
    %cst_247 = arith.constant 1.500000e+01 : f32
    %548 = vector.broadcast %cst_247 : f32 to vector<6x1xf32>
    %549 = arith.mulf %548, %547 : vector<6x1xf32>
    %550 = arith.addf %294, %549 : vector<6x1xf32>
    %cst_248 = arith.constant 1.000000e-30 : f32
    %551 = vector.broadcast %cst_248 : f32 to vector<6x1xf32>
    %552 = arith.maximumf %544, %551 : vector<6x1xf32>
    %553 = math.log %552 : vector<6x1xf32>
    %554 = arith.addf %550, %553 : vector<6x1xf32>
    %555 = arith.mulf %530, %530 : vector<6x16xf32>
    %cst_249 = arith.constant dense<0.000000e+00> : vector<6xf32>
    %556 = vector.multi_reduction <add>, %555, %cst_249 [1] : vector<6x16xf32> to vector<6xf32>
    %557 = vector.shape_cast %556 : vector<6xf32> to vector<6x1xf32>
    %cst_250 = arith.constant -5.000000e-01 : f32
    %558 = vector.broadcast %cst_250 : f32 to vector<6x1xf32>
    %559 = arith.mulf %558, %557 : vector<6x1xf32>
    %cst_251 = arith.constant 14.7030163 : f32
    %560 = vector.broadcast %cst_251 : f32 to vector<6x1xf32>
    %561 = arith.subf %559, %560 : vector<6x1xf32>
    %562 = arith.addf %561, %554 : vector<6x1xf32>
    %563 = vector.shape_cast %562 : vector<6x1xf32> to vector<6x1xf32>
    %564 = vector.broadcast %563 : vector<6x1xf32> to vector<6x128xf32>
    %c0_252 = arith.constant 0 : index
    %c0_253 = arith.constant 0 : index
    %565 = vector.load %arg6[%c0_252, %c0_253] : memref<6x128xf32, #tpu.memory_space<vmem>>, vector<6x128xf32>
    tpu.vector_store %arg6[%c0_252, %c0_253], %564 {strides = array<i32>} : memref<6x128xf32, #tpu.memory_space<vmem>>, vector<6x128xf32>,
    return
  }
}

</mosaic_0001>

<bundles_post_ra>
// kernel: squeeze.1
= control target key start
LH: loop header
LB: loop body
LE: loop exit
PB: predicated region body
PF: predicated region fallthrough
CT: control target
= control target key end

     0   :  { %vm7_vm0 = vcmask 15360   ;;  %s30_s8 = smov 124   ;;  %s47_s0 = inlined_call_operand.vmem [shape: f32[6], index: 0, kind: input, shape index: {}]   ;;  %s48_s1 = inlined_call_operand.vmem [shape: f32[3,2], index: 1, kind: output, shape index: {}]  }
   0x1   :  { %v4_v0 = vld [vmem:[%s47_s0] sm:$0x1]  ;;  %s29_s0 = smov 126  }
   0x2   :  { %5 = vst [vmem:[#allocation1] sm:$0x1] %v4_v0 }
   0x9   :  { %v9_v1 = vld [vmem:[#allocation1] sm:$0x1]  }
   0xa   :  { %v6_v2 = vld [vmem:[#allocation1] sm:$0x1]   ;;  %10 = vrot.lane.b32.xlu0 %v9_v1, %s29_s0 }
   0xb   :  { %8 = vst.msk [vmem:[#allocation0] sm:$0x1] %vm7_vm0, %v6_v2   ;;  %v15_v3 = vld [vmem:[#allocation1] sm:$0x1]  }
   0xe   :  { %16 = vrot.lane.b32.xlu0 %v15_v3, %s30_s8 }
  0x7c   :  { %v11_v4 = vpop.permute.xlu0 %10  }
  0x7d   :  { %14 = vst.msk [vmem:[#allocation0 + $0x1] sm:$0x1] %vm7_vm0, %v11_v4  }
  0x80   :  { %v17_v5 = vpop.permute.xlu0 %16  }
  0x81   :  { %20 = vst.msk [vmem:[#allocation0 + $0x2] sm:$0x1] %vm7_vm0, %v17_v5  }
  0x88   :  { %v24_v6 = vld [vmem:[#allocation0] sm:$0xf] }
  0x89   :  { %26 = vst [vmem:[%s48_s1] sm:$0xf] %v24_v6 }

// kernel: posterior_net_forward.1
= control target key start
LH: loop header
LB: loop body
LE: loop exit
PB: predicated region body
PF: predicated region fallthrough
CT: control target
= control target key end

     0   :  { %s3324_s0 = inlined_call_operand.vmem [shape: f32[512,128], index: 0, kind: input, shape index: {}]   ;;  %s3325_s1 = inlined_call_operand.vmem [shape: f32[128,128], index: 1, kind: input, shape index: {}]   ;;  %s3326_s2 = inlined_call_operand.vmem [shape: f32[6,512], index: 2, kind: input, shape index: {}]   ;;  %s3327_s3 = inlined_call_operand.vmem [shape: f32[128,16], index: 3, kind: input, shape index: {}]   ;;  %s3328_s4 = inlined_call_operand.vmem [shape: f32[16,6,18], index: 4, kind: input, shape index: {}]   ;;  %s3329_s5 = inlined_call_operand.hbm [shape: f32[2,128], index: 5, kind: output, shape index: {0}]   ;;  %s3330_s6 = inlined_call_operand.vmem [shape: f32[6,128], index: 6, kind: output, shape index: {1}]  }
   0x1   :  { %v23_v0 = vld [vmem:[%s3325_s1] sm:$0xff]  ;;  %v24_v1 = vld [vmem:[%s3325_s1 + $0x8] sm:$0xff]  ;;  %v25_v2 = vld [vmem:[%s3325_s1 + $0x10] sm:$0xff] }
   0x2   :  { %v2777_v3 = vpack.c.bf16 %v24_v1, %v23_v0  ;;  %v26_v4 = vld [vmem:[%s3325_s1 + $0x18] sm:$0xff]  ;;  %v27_v6 = vld [vmem:[%s3325_s1 + $0x20] sm:$0xff]  ;;  %v28_v7 = vld [vmem:[%s3325_s1 + $0x28] sm:$0xff] }
   0x3   :  { %v2782_v5 = vpack.c.bf16 %v26_v4, %v25_v2  ;;  %v2795_v8 = vpack.c.bf16 %v28_v7, %v27_v6  ;;  %v217_v9 = vld [vmem:[%s3324_s0 + $0x80] sm:$0xff]  ;;  %v29_v10 = vld [vmem:[%s3325_s1 + $0x30] sm:$0xff]  ;;  %v30_v11 = vld [vmem:[%s3325_s1 + $0x38] sm:$0xff] }
   0x4   :  { %2402 = vmatprep.subr.bf16.mxu1 %v2777_v3  ;;  %2370 = vmatprep.subr.bf16.mxu0 %v2777_v3  ;;  %v2810_v12 = vpack.c.bf16 %v30_v11, %v29_v10  ;;  %v31_v13 = vld [vmem:[%s3325_s1 + $0x40] sm:$0xff]  ;;  %v32_v14 = vld [vmem:[%s3325_s1 + $0x48] sm:$0xff]  ;;  %v33_v17 = vld [vmem:[%s3325_s1 + $0x50] sm:$0xff] }
   0x5   :  { %2404 = vmatpush3.bf16.msra.mxu1 %v2777_v3  ;;  %2372 = vmatpush3.bf16.msra.mxu0 %v2777_v3  ;;  %v39_v15 = vld [vmem:[%s3324_s0] sm:$0xff]  ;;  %v2825_v16 = vpack.c.bf16 %v32_v14, %v31_v13  ;;  %v34_v18 = vld [vmem:[%s3325_s1 + $0x58] sm:$0xff]  ;;  %v36_v21 = vld [vmem:[%s3325_s1 + $0x68] sm:$0xff] }
   0x6   :  { %2406 = vmatprep.subr.bf16.mxu1 %v2782_v5  ;;  %2374 = vmatprep.subr.bf16.mxu0 %v2782_v5  ;;  %v2837_v19 = vpack.c.bf16 %v34_v18, %v33_v17  ;;  %v35_v20 = vld [vmem:[%s3325_s1 + $0x60] sm:$0xff]  ;;  %v37_v23 = vld [vmem:[%s3325_s1 + $0x70] sm:$0xff]  ;;  %v38_v24 = vld [vmem:[%s3325_s1 + $0x78] sm:$0xff] }
   0x7   :  { %2058 = vmatprep.mubr.f32.mxu1 %v217_v9  ;;  %2002 = vmatprep.mubr.f32.mxu0 %v39_v15  ;;  %v2849_v22 = vpack.c.bf16 %v36_v21, %v35_v20  ;;  %v2861_v25 = vpack.c.bf16 %v38_v24, %v37_v23 }
   0x9   :  { %2408 = vmatpush3.bf16.msra.mxu1 %v2782_v5  ;;  %2376 = vmatpush3.bf16.msra.mxu0 %v2782_v5 }
   0xa   :  { %2410 = vmatprep.subr.bf16.mxu1 %v2795_v8  ;;  %2378 = vmatprep.subr.bf16.mxu0 %v2795_v8 }
   0xd   :  { %2412 = vmatpush3.bf16.msra.mxu1 %v2795_v8  ;;  %2380 = vmatpush3.bf16.msra.mxu0 %v2795_v8 }
   0xe   :  { %2414 = vmatprep.subr.bf16.mxu1 %v2810_v12  ;;  %2382 = vmatprep.subr.bf16.mxu0 %v2810_v12 }
  0x11   :  { %2416 = vmatpush3.bf16.msra.mxu1 %v2810_v12  ;;  %2384 = vmatpush3.bf16.msra.mxu0 %v2810_v12 }
  0x12   :  { %2418 = vmatprep.subr.bf16.mxu1 %v2825_v16  ;;  %2386 = vmatprep.subr.bf16.mxu0 %v2825_v16 }
  0x15   :  { %2420 = vmatpush3.bf16.msra.mxu1 %v2825_v16  ;;  %2388 = vmatpush3.bf16.msra.mxu0 %v2825_v16 }
  0x16   :  { %2422 = vmatprep.subr.bf16.mxu1 %v2837_v19  ;;  %2390 = vmatprep.subr.bf16.mxu0 %v2837_v19 }
  0x19   :  { %2424 = vmatpush3.bf16.msra.mxu1 %v2837_v19  ;;  %2392 = vmatpush3.bf16.msra.mxu0 %v2837_v19 }
  0x1a   :  { %2426 = vmatprep.subr.bf16.mxu1 %v2849_v22  ;;  %2394 = vmatprep.subr.bf16.mxu0 %v2849_v22 }
  0x1b   :  { %12 = vsyncpa [#allocation3], 0  ;;  %v218_v26 = vld [vmem:[%s3324_s0 + $0x88] sm:$0xff]  ;;  %v219_v28 = vld [vmem:[%s3324_s0 + $0x90] sm:$0xff]  ;;  %v2727_v23 = vmov 0.0|0.0   ;;  %vm2728_vm0 = vmmov 0  }
  0x1c   :  { %v40_v27 = vld [vmem:[%s3324_s0 + $0x8] sm:$0xff]  ;;  %v41_v29 = vld [vmem:[%s3324_s0 + $0x10] sm:$0xff]  ;;  %v220_v30 = vld [vmem:[%s3324_s0 + $0x98] sm:$0xff]  ;;  %vm1123_vm1 = vcmask 128000  }
  0x1d   :  { %2428 = vmatpush3.bf16.msra.mxu1 %v2849_v22  ;;  %2396 = vmatpush3.bf16.msra.mxu0 %v2849_v22  ;;  %v42_v31 = vld [vmem:[%s3324_s0 + $0x18] sm:$0xff]  ;;  %v221_v32 = vld [vmem:[%s3324_s0 + $0xa0] sm:$0xff]  ;;  %v222_v34 = vld [vmem:[%s3324_s0 + $0xa8] sm:$0xff] }
  0x1e   :  { %2430 = vmatprep.subr.bf16.mxu1 %v2861_v25  ;;  %2398 = vmatprep.subr.bf16.mxu0 %v2861_v25  ;;  %v43_v33 = vld [vmem:[%s3324_s0 + $0x20] sm:$0xff]  ;;  %v44_v35 = vld [vmem:[%s3324_s0 + $0x28] sm:$0xff]  ;;  %v223_v36 = vld [vmem:[%s3324_s0 + $0xb0] sm:$0xff] }
  0x1f   :  { %v45_v37 = vld [vmem:[%s3324_s0 + $0x30] sm:$0xff]  ;;  %v224_v38 = vld [vmem:[%s3324_s0 + $0xb8] sm:$0xff]  ;;  %v225_v40 = vld [vmem:[%s3324_s0 + $0xc0] sm:$0xff] }
  0x20   :  { %v46_v39 = vld [vmem:[%s3324_s0 + $0x38] sm:$0xff]  ;;  %v47_v41 = vld [vmem:[%s3324_s0 + $0x40] sm:$0xff]  ;;  %v226_v42 = vld [vmem:[%s3324_s0 + $0xc8] sm:$0xff] }
  0x21   :  { %2432 = vmatpush3.bf16.msra.mxu1 %v2861_v25  ;;  %2400 = vmatpush3.bf16.msra.mxu0 %v2861_v25  ;;  %v48_v43 = vld [vmem:[%s3324_s0 + $0x48] sm:$0xff]  ;;  %v227_v44 = vld [vmem:[%s3324_s0 + $0xd0] sm:$0xff]  ;;  %v228_v46 = vld [vmem:[%s3324_s0 + $0xd8] sm:$0xff] }
  0x22   :  { %2482 = vmatprep.subr.bf16.mxu1 %v2777_v3  ;;  %v49_v45 = vld [vmem:[%s3324_s0 + $0x50] sm:$0xff]  ;;  %v50_v47 = vld [vmem:[%s3324_s0 + $0x58] sm:$0xff]  ;;  %v229_v48 = vld [vmem:[%s3324_s0 + $0xe0] sm:$0xff]  ;;  %2433 = vmatprep.subr.bf16.mxu0 %v2727_v23 }
  0x23   :  { %v51_v49 = vld [vmem:[%s3324_s0 + $0x60] sm:$0xff]  ;;  %v230_v50 = vld [vmem:[%s3324_s0 + $0xe8] sm:$0xff]  ;;  %v231_v52 = vld [vmem:[%s3324_s0 + $0xf0] sm:$0xff] }
  0x24   :  { %2059 = vmatmul.mubr.f32.vlgmr.msra.gmra.mrb[0].mxu1 %v218_v26  ;;  %2003 = vmatmul.mubr.f32.vlgmr.msra.gmra.mrb[0].mxu0 %v40_v27  ;;  %v52_v51 = vld [vmem:[%s3324_s0 + $0x68] sm:$0xff]  ;;  %v53_v53 = vld [vmem:[%s3324_s0 + $0x70] sm:$0xff]  ;;  %v232_v54 = vld [vmem:[%s3324_s0 + $0xf8] sm:$0xff] }
  0x25   :  { %2061 = vmatprep.mubr.f32.mxu1 %v219_v28  ;;  %2484 = vmatpush3.bf16.msra.mxu1 %v2777_v3  ;;  %v54_v55 = vld [vmem:[%s3324_s0 + $0x78] sm:$0xff]  ;;  %v535_v56 = vld [vmem:[%s3324_s0 + $0x100] sm:$0xff]  ;;  %v536_v57 = vld [vmem:[%s3324_s0 + $0x108] sm:$0xff] }
  0x26   :  { %2005 = vmatprep.mubr.f32.mxu0 %v41_v29  ;;  %2486 = vmatprep.subr.bf16.mxu1 %v2782_v5  ;;  %v537_v58 = vld [vmem:[%s3324_s0 + $0x110] sm:$0xff]  ;;  %v538_v59 = vld [vmem:[%s3324_s0 + $0x118] sm:$0xff]  ;;  %v539_v60 = vld [vmem:[%s3324_s0 + $0x120] sm:$0xff] }
  0x27   :  { %v540_v61 = vld [vmem:[%s3324_s0 + $0x128] sm:$0xff]  ;;  %v541_v62 = vld [vmem:[%s3324_s0 + $0x130] sm:$0xff]  ;;  %v542_v63 = vld [vmem:[%s3324_s0 + $0x138] sm:$0xff] }
  0x28   :  { %2062 = vmatmul.mubr.f32.gmra.mrb[2].mxu1 %v220_v30  ;;  %2006 = vmatmul.mubr.f32.gmra.mrb[2].mxu0 %v42_v31  ;;  %v543_v0 = vld [vmem:[%s3324_s0 + $0x140] sm:$0xff]  ;;  %v544_v1 = vld [vmem:[%s3324_s0 + $0x148] sm:$0xff]  ;;  %v545_v2 = vld [vmem:[%s3324_s0 + $0x150] sm:$0xff] }
  0x29   :  { %2064 = vmatprep.mubr.f32.mxu1 %v221_v32  ;;  %2488 = vmatpush3.bf16.msra.mxu1 %v2782_v5  ;;  %v547_v4 = vld [vmem:[%s3324_s0 + $0x160] sm:$0xff]  ;;  %v549_v6 = vld [vmem:[%s3324_s0 + $0x170] sm:$0xff]  ;;  %v550_v7 = vld [vmem:[%s3324_s0 + $0x178] sm:$0xff] }
  0x2a   :  { %2008 = vmatprep.mubr.f32.mxu0 %v43_v33  ;;  %2490 = vmatprep.subr.bf16.mxu1 %v2795_v8  ;;  %v785_v9 = vld [vmem:[%s3324_s0 + $0x188] sm:$0xff]  ;;  %v786_v10 = vld [vmem:[%s3324_s0 + $0x190] sm:$0xff]  ;;  %v787_v11 = vld [vmem:[%s3324_s0 + $0x198] sm:$0xff] }
  0x2b   :  { %v789_v13 = vld [vmem:[%s3324_s0 + $0x1a8] sm:$0xff]  ;;  %v790_v14 = vld [vmem:[%s3324_s0 + $0x1b0] sm:$0xff]  ;;  %v791_v15 = vld [vmem:[%s3324_s0 + $0x1b8] sm:$0xff] }
  0x2c   :  { %2065 = vmatmul.mubr.f32.gmra.mrb[4].mxu1 %v222_v34  ;;  %2009 = vmatmul.mubr.f32.gmra.mrb[4].mxu0 %v44_v35  ;;  %v793_v17 = vld [vmem:[%s3324_s0 + $0x1c8] sm:$0xff]  ;;  %v794_v18 = vld [vmem:[%s3324_s0 + $0x1d0] sm:$0xff]  ;;  %v796_v20 = vld [vmem:[%s3324_s0 + $0x1e0] sm:$0xff] }
  0x2d   :  { %2067 = vmatprep.mubr.f32.mxu1 %v223_v36  ;;  %2492 = vmatpush3.bf16.msra.mxu1 %v2795_v8  ;;  %v797_v21 = vld [vmem:[%s3324_s0 + $0x1e8] sm:$0xff]  ;;  %v799_v24 = vld [vmem:[%s3324_s0 + $0x1f8] sm:$0xff] }
  0x2e   :  { %2011 = vmatprep.mubr.f32.mxu0 %v45_v37  ;;  %2494 = vmatprep.subr.bf16.mxu1 %v2810_v12 }
  0x30   :  { %2068 = vmatmul.mubr.f32.gmra.mrb[6].mxu1 %v224_v38  ;;  %2012 = vmatmul.mubr.f32.gmra.mrb[6].mxu0 %v46_v39 }
  0x31   :  { %2070 = vmatprep.mubr.f32.mxu1 %v225_v40  ;;  %2496 = vmatpush3.bf16.msra.mxu1 %v2810_v12 }
  0x32   :  { %2014 = vmatprep.mubr.f32.mxu0 %v47_v41  ;;  %2498 = vmatprep.subr.bf16.mxu1 %v2825_v16 }
  0x34   :  { %2071 = vmatmul.mubr.f32.gmra.mrb[8].mxu1 %v226_v42  ;;  %2015 = vmatmul.mubr.f32.gmra.mrb[8].mxu0 %v48_v43  ;;  %v1034_v42 = vld [vmem:[%s3327_s3] sm:$0xff]  ;;  %v1035_v43 = vld [vmem:[%s3327_s3 + $0x8] sm:$0xff] }
  0x35   :  { %2073 = vmatprep.mubr.f32.mxu1 %v227_v44  ;;  %2500 = vmatpush3.bf16.msra.mxu1 %v2825_v16 }
  0x36   :  { %2017 = vmatprep.mubr.f32.mxu0 %v49_v45  ;;  %2502 = vmatprep.subr.bf16.mxu1 %v2837_v19 }
  0x38   :  { %2074 = vmatmul.mubr.f32.gmra.mrb[10].mxu1 %v228_v46  ;;  %2018 = vmatmul.mubr.f32.gmra.mrb[10].mxu0 %v50_v47  ;;  %v2594_v46 = vpack.c.bf16 %v1035_v43, %v1034_v42  ;;  %v1036_v47 = vld [vmem:[%s3327_s3 + $0x10] sm:$0xff] }
  0x39   :  { %2076 = vmatprep.mubr.f32.mxu1 %v229_v48  ;;  %2504 = vmatpush3.bf16.msra.mxu1 %v2837_v19  ;;  %v1037_v48 = vld [vmem:[%s3327_s3 + $0x18] sm:$0xff] }
  0x3a   :  { %2020 = vmatprep.mubr.f32.mxu0 %v51_v49  ;;  %2506 = vmatprep.subr.bf16.mxu1 %v2849_v22 }
  0x3c   :  { %2077 = vmatmul.mubr.f32.gmra.mrb[12].mxu1 %v230_v50  ;;  %2021 = vmatmul.mubr.f32.gmra.mrb[12].mxu0 %v52_v51 }
  0x3d   :  { %2079 = vmatprep.mubr.f32.mxu1 %v231_v52  ;;  %2508 = vmatpush3.bf16.msra.mxu1 %v2849_v22 }
  0x3e   :  { %2023 = vmatprep.mubr.f32.mxu0 %v53_v53  ;;  %2510 = vmatprep.subr.bf16.mxu1 %v2861_v25  ;;  %v2597_v53 = vpack.c.bf16 %v1037_v48, %v1036_v47 }
  0x40   :  { %2080 = vmatmul.mubr.f32.gmra.mrb[14].mxu1 %v232_v54  ;;  %2024 = vmatmul.mubr.f32.gmra.mrb[14].mxu0 %v54_v55 }
  0x41   :  { %2512 = vmatpush3.bf16.msra.mxu1 %v2861_v25  ;;  %2184 = vmatprep.mubr.f32.mxu1 %v535_v56 }
  0x42   :  { %2538 = vmatprep.subr.bf16.mxu1 %v2777_v3 }
  0x44   :  { %2185 = vmatmul.mubr.f32.vlgmr.msra.gmra.mrb[16].mxu1 %v536_v57 }
  0x45   :  { %2540 = vmatpush3.bf16.msra.mxu1 %v2777_v3  ;;  %2187 = vmatprep.mubr.f32.mxu1 %v537_v58  ;;  %v546_v3 = vld [vmem:[%s3324_s0 + $0x158] sm:$0xff]  ;;  %v1038_v58 = vld [vmem:[%s3327_s3 + $0x20] sm:$0xff] }
  0x46   :  { %2542 = vmatprep.subr.bf16.mxu1 %v2782_v5 }
  0x48   :  { %2188 = vmatmul.mubr.f32.gmra.mrb[18].mxu1 %v538_v59  ;;  %v1039_v59 = vld [vmem:[%s3327_s3 + $0x28] sm:$0xff] }
  0x49   :  { %2544 = vmatpush3.bf16.msra.mxu1 %v2782_v5  ;;  %2190 = vmatprep.mubr.f32.mxu1 %v539_v60  ;;  %v548_v5 = vld [vmem:[%s3324_s0 + $0x168] sm:$0xff] }
  0x4a   :  { %2546 = vmatprep.subr.bf16.mxu1 %v2795_v8 }
  0x4c   :  { %2191 = vmatmul.mubr.f32.gmra.mrb[20].mxu1 %v540_v61 }
  0x4d   :  { %2548 = vmatpush3.bf16.msra.mxu1 %v2795_v8  ;;  %2193 = vmatprep.mubr.f32.mxu1 %v541_v62  ;;  %v784_v8 = vld [vmem:[%s3324_s0 + $0x180] sm:$0xff] }
  0x4e   :  { %2550 = vmatprep.subr.bf16.mxu1 %v2810_v12 }
  0x50   :  { %2194 = vmatmul.mubr.f32.gmra.mrb[22].mxu1 %v542_v63 }
  0x51   :  { %2552 = vmatpush3.bf16.msra.mxu1 %v2810_v12  ;;  %2196 = vmatprep.mubr.f32.mxu1 %v543_v0  ;;  %v788_v12 = vld [vmem:[%s3324_s0 + $0x1a0] sm:$0xff] }
  0x52   :  { %2554 = vmatprep.subr.bf16.mxu1 %v2825_v16 }
  0x54   :  { %2197 = vmatmul.mubr.f32.gmra.mrb[24].mxu1 %v544_v1 }
  0x55   :  { %2556 = vmatpush3.bf16.msra.mxu1 %v2825_v16  ;;  %2199 = vmatprep.mubr.f32.mxu1 %v545_v2  ;;  %v792_v16 = vld [vmem:[%s3324_s0 + $0x1c0] sm:$0xff]  ;;  %v2600_v2 = vpack.c.bf16 %v1039_v59, %v1038_v58 }
  0x56   :  { %2558 = vmatprep.subr.bf16.mxu1 %v2837_v19 }
  0x58   :  { %2200 = vmatmul.mubr.f32.gmra.mrb[26].mxu1 %v546_v3 }
  0x59   :  { %2560 = vmatpush3.bf16.msra.mxu1 %v2837_v19  ;;  %2202 = vmatprep.mubr.f32.mxu1 %v547_v4  ;;  %v795_v19 = vld [vmem:[%s3324_s0 + $0x1d8] sm:$0xff] }
  0x5a   :  { %2562 = vmatprep.subr.bf16.mxu1 %v2849_v22 }
  0x5c   :  { %2203 = vmatmul.mubr.f32.gmra.mrb[28].mxu1 %v548_v5 }
  0x5d   :  { %2564 = vmatpush3.bf16.msra.mxu1 %v2849_v22  ;;  %2205 = vmatprep.mubr.f32.mxu1 %v549_v6  ;;  %v798_v22 = vld [vmem:[%s3324_s0 + $0x1f0] sm:$0xff] }
  0x5e   :  { %2566 = vmatprep.subr.bf16.mxu1 %v2861_v25 }
  0x60   :  { %2206 = vmatmul.mubr.f32.gmra.mrb[30].mxu1 %v550_v7  ;;  %v1040_v7 = vld [vmem:[%s3327_s3 + $0x30] sm:$0xff] }
  0x61   :  { %2568 = vmatpush3.bf16.msra.mxu1 %v2861_v25  ;;  %2275 = vmatprep.mubr.f32.mxu1 %v784_v8  ;;  %v2729_v25 = vmov 0.0   ;;  %v1041_v8 = vld [vmem:[%s3327_s3 + $0x38] sm:$0xff] }
  0x62   :  { %2593 = vmatprep.subr.bf16.mxu1 %v2727_v23  ;;  %2114 = vmatprep.mubr.msk.f32.mxu0 %vm2728_vm0, %v2729_v25 }
  0x64   :  { %2276 = vmatmul.mubr.f32.vlgmr.msra.gmra.mrb[32].mxu1 %v785_v9 }
  0x65   :  { %2278 = vmatprep.mubr.f32.mxu1 %v786_v10  ;;  %2595 = vmatpush3.bf16.msra.mxu1 %v2594_v46 }
  0x66   :  { %2596 = vmatprep.subr.bf16.mxu1 %v2727_v23 }
  0x68   :  { %2279 = vmatmul.mubr.f32.gmra.mrb[34].mxu1 %v787_v11 }
  0x69   :  { %2281 = vmatprep.mubr.f32.mxu1 %v788_v12  ;;  %2598 = vmatpush3.bf16.msra.mxu1 %v2597_v53 }
  0x6a   :  { %2599 = vmatprep.subr.bf16.mxu1 %v2727_v23 }
  0x6c   :  { %2282 = vmatmul.mubr.f32.gmra.mrb[36].mxu1 %v789_v13 }
  0x6d   :  { %2284 = vmatprep.mubr.f32.mxu1 %v790_v14  ;;  %2601 = vmatpush3.bf16.msra.mxu1 %v2600_v2 }
  0x6e   :  { %2602 = vmatprep.subr.bf16.mxu1 %v2727_v23 }
  0x70   :  { %2285 = vmatmul.mubr.f32.gmra.mrb[38].mxu1 %v791_v15  ;;  %v2603_v15 = vpack.c.bf16 %v1041_v8, %v1040_v7 }
  0x71   :  { %2287 = vmatprep.mubr.f32.mxu1 %v792_v16 }
  0x72   :  { %2604 = vmatpush3.bf16.msra.mxu1 %v2603_v15 }
  0x73   :  { %2605 = vmatprep.subr.bf16.mxu1 %v2727_v23 }
  0x74   :  { %2288 = vmatmul.mubr.f32.gmra.mrb[40].mxu1 %v793_v17 }
  0x75   :  { %2290 = vmatprep.mubr.f32.mxu1 %v794_v18 }
  0x78   :  { %2291 = vmatmul.mubr.f32.gmra.mrb[42].mxu1 %v795_v19 }
  0x79   :  { %2293 = vmatprep.mubr.f32.mxu1 %v796_v20  ;;  %v1042_v20 = vld [vmem:[%s3327_s3 + $0x40] sm:$0xff] }
  0x7c   :  { %2294 = vmatmul.mubr.f32.gmra.mrb[44].mxu1 %v797_v21  ;;  %v1043_v21 = vld [vmem:[%s3327_s3 + $0x48] sm:$0xff] }
  0x7d   :  { %2296 = vmatprep.mubr.f32.mxu1 %v798_v22 }
  0x80   :  { %2297 = vmatmul.mubr.f32.gmra.mrb[46].mxu1 %v799_v24 }
  0x81   :  { %2366 = vmatprep.mubr.msk.f32.mxu1 %vm2728_vm0, %v2729_v25 }
  0xf7   :  { %v2060_v26 = vpop.f32.mrb[0].mxu1  ;;  %v2004_v27 = vpop.f32.mrb[0].mxu0 }
  0xf8   :  { %v379_v28 = vmax.f32 %v2060_v26, 0.0  ;;  %v299_v29 = vpop.f32.mrb[1].mxu1  ;;  %v201_v30 = vmax.f32 %v2004_v27, 0.0  ;;  %v121_v31 = vpop.f32.mrb[1].mxu0 }
  0xf9   :  { %v378_v32 = vmax.f32 %v299_v29, 0.0  ;;  %v200_v33 = vmax.f32 %v121_v31, 0.0 }
  0xfb   :  { %v2434_v34 = vpack.c.bf16 %v379_v28, %v378_v32  ;;  %v2063_v35 = vpop.f32.mrb[2].mxu1  ;;  %v3094_v36 = vpack.c.bf16 %v201_v30, %v200_v33  ;;  %v2007_v37 = vpop.f32.mrb[2].mxu0  ;;  %v2606_v30 = vpack.c.bf16 %v1043_v21, %v1042_v20 }
  0xfc   :  { %v381_v38 = vmax.f32 %v2063_v35, 0.0  ;;  %v309_v39 = vpop.f32.mrb[3].mxu1  ;;  %v203_v40 = vmax.f32 %v2007_v37, 0.0  ;;  %v131_v41 = vpop.f32.mrb[3].mxu0  ;;  %v1044_v35 = vld [vmem:[%s3327_s3 + $0x50] sm:$0xff]  ;;  %v1045_v37 = vld [vmem:[%s3327_s3 + $0x58] sm:$0xff] }
  0xfd   :  { %v380_v44 = vmax.f32 %v309_v39, 0.0  ;;  %2435 = vmatpush3.bf16.msra.mxu0 %v2434_v34  ;;  %v202_v45 = vmax.f32 %v131_v41, 0.0  ;;  %2607 = vmatpush3.bf16.msra.mxu1 %v2606_v30 }
  0xfe   :  { %2436 = vmatprep.subr.bf16.mxu0 %v2727_v23  ;;  %2608 = vmatprep.subr.bf16.mxu1 %v2727_v23 }
  0xff   :  { %v2437_v49 = vpack.c.bf16 %v381_v38, %v380_v44  ;;  %v2066_v50 = vpop.f32.mrb[4].mxu1  ;;  %v3109_v51 = vpack.c.bf16 %v203_v40, %v202_v45  ;;  %v2010_v52 = vpop.f32.mrb[4].mxu0  ;;  %v2609_v44 = vpack.c.bf16 %v1045_v37, %v1044_v35 }
 0x100   :  { %v383_v54 = vmax.f32 %v2066_v50, 0.0  ;;  %v319_v55 = vpop.f32.mrb[5].mxu1  ;;  %v205_v56 = vmax.f32 %v2010_v52, 0.0  ;;  %v141_v57 = vpop.f32.mrb[5].mxu0  ;;  %v1047_v50 = vld [vmem:[%s3327_s3 + $0x68] sm:$0xff] }
 0x101   :  { %v382_v60 = vmax.f32 %v319_v55, 0.0  ;;  %2438 = vmatpush3.bf16.msra.mxu0 %v2437_v49  ;;  %v204_v61 = vmax.f32 %v141_v57, 0.0  ;;  %v1046_v49 = vld [vmem:[%s3327_s3 + $0x60] sm:$0xff]  ;;  %2610 = vmatpush3.bf16.msra.mxu1 %v2609_v44 }
 0x102   :  { %2439 = vmatprep.subr.bf16.mxu0 %v2727_v23  ;;  %v2612_v58 = vpack.c.bf16 %v1047_v50, %v1046_v49  ;;  %2611 = vmatprep.subr.bf16.mxu1 %v2727_v23 }
 0x103   :  { %v2440_v62 = vpack.c.bf16 %v383_v54, %v382_v60  ;;  %v2069_v63 = vpop.f32.mrb[6].mxu1  ;;  %v3119_v0 = vpack.c.bf16 %v205_v56, %v204_v61  ;;  %v2013_v1 = vpop.f32.mrb[6].mxu0 }
 0x104   :  { %v385_v3 = vmax.f32 %v2069_v63, 0.0  ;;  %v329_v4 = vpop.f32.mrb[7].mxu1  ;;  %v207_v5 = vmax.f32 %v2013_v1, 0.0  ;;  %v151_v6 = vpop.f32.mrb[7].mxu0  ;;  %v1048_v63 = vld [vmem:[%s3327_s3 + $0x70] sm:$0xff]  ;;  %v1049_v1 = vld [vmem:[%s3327_s3 + $0x78] sm:$0xff] }
 0x105   :  { %v384_v9 = vmax.f32 %v329_v4, 0.0  ;;  %2441 = vmatpush3.bf16.msra.mxu0 %v2440_v62  ;;  %v206_v10 = vmax.f32 %v151_v6, 0.0  ;;  %2613 = vmatpush3.bf16.msra.mxu1 %v2612_v58  ;;  %v2615_v7 = vpack.c.bf16 %v1049_v1, %v1048_v63 }
 0x106   :  { %2442 = vmatprep.subr.bf16.mxu0 %v2727_v23  ;;  %2614 = vmatprep.subr.bf16.mxu1 %v2727_v23 }
 0x107   :  { %v2443_v11 = vpack.c.bf16 %v385_v3, %v384_v9  ;;  %v2072_v12 = vpop.f32.mrb[8].mxu1  ;;  %v3129_v13 = vpack.c.bf16 %v207_v5, %v206_v10  ;;  %v2016_v14 = vpop.f32.mrb[8].mxu0  ;;  %v394_v10 = vld [vmem:[%s3326_s2 + $0x8] sm:$0x3f] }
 0x108   :  { %v387_v16 = vmax.f32 %v2072_v12, 0.0  ;;  %v339_v17 = vpop.f32.mrb[9].mxu1  ;;  %v209_v18 = vmax.f32 %v2016_v14, 0.0  ;;  %v161_v19 = vpop.f32.mrb[9].mxu0 }
 0x109   :  { %v386_v22 = vmax.f32 %v339_v17, 0.0  ;;  %2444 = vmatpush3.bf16.msra.mxu0 %v2443_v11  ;;  %v208_v24 = vmax.f32 %v161_v19, 0.0  ;;  %2616 = vmatpush3.bf16.msra.mxu1 %v2615_v7 }
 0x10a   :  { %2445 = vmatprep.subr.bf16.mxu0 %v2727_v23 }
 0x10b   :  { %v2446_v26 = vpack.c.bf16 %v387_v16, %v386_v22  ;;  %v2075_v27 = vpop.f32.mrb[10].mxu1  ;;  %v3139_v28 = vpack.c.bf16 %v209_v18, %v208_v24  ;;  %v2019_v29 = vpop.f32.mrb[10].mxu0 }
 0x10c   :  { %v389_v31 = vmax.f32 %v2075_v27, 0.0  ;;  %v349_v32 = vpop.f32.mrb[11].mxu1  ;;  %v211_v33 = vmax.f32 %v2019_v29, 0.0  ;;  %v171_v34 = vpop.f32.mrb[11].mxu0 }
 0x10d   :  { %v388_v38 = vmax.f32 %v349_v32, 0.0  ;;  %2447 = vmatpush3.bf16.msra.mxu0 %v2446_v26  ;;  %v210_v39 = vmax.f32 %v171_v34, 0.0 }
 0x10e   :  { %2448 = vmatprep.subr.bf16.mxu0 %v2727_v23 }
 0x10f   :  { %v2449_v40 = vpack.c.bf16 %v389_v31, %v388_v38  ;;  %v2078_v41 = vpop.f32.mrb[12].mxu1  ;;  %v3149_v42 = vpack.c.bf16 %v211_v33, %v210_v39  ;;  %v2022_v43 = vpop.f32.mrb[12].mxu0 }
 0x110   :  { %v391_v45 = vmax.f32 %v2078_v41, 0.0  ;;  %v359_v46 = vpop.f32.mrb[13].mxu1  ;;  %v213_v47 = vmax.f32 %v2022_v43, 0.0  ;;  %v181_v48 = vpop.f32.mrb[13].mxu0 }
 0x111   :  { %v390_v52 = vmax.f32 %v359_v46, 0.0  ;;  %2450 = vmatpush3.bf16.msra.mxu0 %v2449_v40  ;;  %v212_v53 = vmax.f32 %v181_v48, 0.0 }
 0x112   :  { %2451 = vmatprep.subr.bf16.mxu0 %v2727_v23 }
 0x113   :  { %v2452_v54 = vpack.c.bf16 %v391_v45, %v390_v52  ;;  %v2081_v55 = vpop.f32.mrb[14].mxu1  ;;  %v3159_v56 = vpack.c.bf16 %v213_v47, %v212_v53  ;;  %v2025_v57 = vpop.f32.mrb[14].mxu0 }
 0x114   :  { %v393_v59 = vmax.f32 %v2081_v55, 0.0  ;;  %v369_v60 = vpop.f32.mrb[15].mxu1  ;;  %v215_v61 = vmax.f32 %v2025_v57, 0.0  ;;  %v191_v62 = vpop.f32.mrb[15].mxu0 }
 0x115   :  { %v392_v2 = vmax.f32 %v369_v60, 0.0  ;;  %2453 = vmatpush3.bf16.msra.mxu0 %v2452_v54  ;;  %v214_v3 = vmax.f32 %v191_v62, 0.0 }
 0x116   :  { %2454 = vmatprep.subr.bf16.mxu0 %v2727_v23 }
 0x117   :  { %v2455_v4 = vpack.c.bf16 %v393_v59, %v392_v2  ;;  %v3169_v5 = vpack.c.bf16 %v215_v61, %v214_v3  ;;  %v2186_v6 = vpop.f32.mrb[16].mxu1 }
 0x118   :  { %v697_v8 = vmax.f32 %v2186_v6, 0.0  ;;  %v617_v9 = vpop.f32.mrb[17].mxu1 }
 0x119   :  { %2456 = vmatpush3.bf16.msra.mxu0 %v2455_v4  ;;  %v696_v11 = vmax.f32 %v617_v9, 0.0 }
 0x11a   :  { %2457 = vmatprep.subr.bf16.mxu0 %v2727_v23 }
 0x11b   :  { %v3176_v12 = vpack.c.bf16 %v697_v8, %v696_v11  ;;  %v2189_v14 = vpop.f32.mrb[18].mxu1 }
 0x11c   :  { %2115 = vmatmul.mubr.f32.vlgmr.msra.gmra.mrb[16].mxu0 %v394_v10  ;;  %v699_v15 = vmax.f32 %v2189_v14, 0.0  ;;  %v627_v16 = vpop.f32.mrb[19].mxu1 }
 0x11d   :  { %2459 = vmatpush3.bf16.msra.mxu0 %v3094_v36  ;;  %v698_v17 = vmax.f32 %v627_v16, 0.0  ;;  %2149 = vmatprep.mubr.msk.f32.mxu0 %vm2728_vm0, %v2729_v25 }
 0x11e   :  { %2460 = vmatprep.subr.bf16.mxu0 %v2727_v23 }
 0x11f   :  { %v2517_v18 = vpack.c.bf16 %v699_v15, %v698_v17  ;;  %v2192_v19 = vpop.f32.mrb[20].mxu1 }
 0x120   :  { %v701_v20 = vmax.f32 %v2192_v19, 0.0  ;;  %v637_v21 = vpop.f32.mrb[21].mxu1 }
 0x121   :  { %2462 = vmatpush3.bf16.msra.mxu0 %v3109_v51  ;;  %v700_v22 = vmax.f32 %v637_v21, 0.0 }
 0x122   :  { %2463 = vmatprep.subr.bf16.mxu0 %v2727_v23 }
 0x123   :  { %v2520_v24 = vpack.c.bf16 %v701_v20, %v700_v22  ;;  %v2195_v26 = vpop.f32.mrb[22].mxu1 }
 0x124   :  { %v703_v27 = vmax.f32 %v2195_v26, 0.0  ;;  %v647_v29 = vpop.f32.mrb[23].mxu1 }
 0x125   :  { %2465 = vmatpush3.bf16.msra.mxu0 %v3119_v0  ;;  %v702_v36 = vmax.f32 %v647_v29, 0.0 }
 0x126   :  { %2466 = vmatprep.subr.bf16.mxu0 %v2727_v23 }
 0x127   :  { %v2523_v30 = vpack.c.bf16 %v703_v27, %v702_v36  ;;  %v2198_v31 = vpop.f32.mrb[24].mxu1 }
 0x128   :  { %v705_v32 = vmax.f32 %v2198_v31, 0.0  ;;  %v657_v33 = vpop.f32.mrb[25].mxu1 }
 0x129   :  { %2468 = vmatpush3.bf16.msra.mxu0 %v3129_v13  ;;  %v704_v34 = vmax.f32 %v657_v33, 0.0  ;;  %v1120_v33 = vld [vmem:[%s3328_s4] sm:$0x3f] }
 0x12a   :  { %2469 = vmatprep.subr.bf16.mxu0 %v2727_v23 }
 0x12b   :  { %v2526_v51 = vpack.c.bf16 %v705_v32, %v704_v34  ;;  %v2201_v35 = vpop.f32.mrb[26].mxu1 }
 0x12c   :  { %v707_v37 = vmax.f32 %v2201_v35, 0.0  ;;  %v667_v38 = vpop.f32.mrb[27].mxu1 }
 0x12d   :  { %2471 = vmatpush3.bf16.msra.mxu0 %v3139_v28  ;;  %v706_v39 = vmax.f32 %v667_v38, 0.0 }
 0x12e   :  { %2472 = vmatprep.subr.bf16.mxu0 %v2727_v23 }
 0x12f   :  { %v2529_v0 = vpack.c.bf16 %v707_v37, %v706_v39  ;;  %v2204_v40 = vpop.f32.mrb[28].mxu1 }
 0x130   :  { %v709_v41 = vmax.f32 %v2204_v40, 0.0  ;;  %v677_v43 = vpop.f32.mrb[29].mxu1 }
 0x131   :  { %2474 = vmatpush3.bf16.msra.mxu0 %v3149_v42  ;;  %v708_v44 = vmax.f32 %v677_v43, 0.0  ;;  %v216_v42 = vld [vmem:[%s3326_s2] sm:$0x3f] }
 0x132   :  { %2475 = vmatprep.subr.bf16.mxu0 %v2727_v23 }
 0x133   :  { %v2532_v13 = vpack.c.bf16 %v709_v41, %v708_v44  ;;  %v2207_v45 = vpop.f32.mrb[30].mxu1 }
 0x134   :  { %v711_v46 = vmax.f32 %v2207_v45, 0.0  ;;  %v687_v47 = vpop.f32.mrb[31].mxu1 }
 0x135   :  { %2477 = vmatpush3.bf16.msra.mxu0 %v3159_v56  ;;  %v710_v48 = vmax.f32 %v687_v47, 0.0 }
 0x136   :  { %2478 = vmatprep.subr.bf16.mxu0 %v2727_v23 }
 0x137   :  { %v2535_v28 = vpack.c.bf16 %v711_v46, %v710_v48  ;;  %v2277_v49 = vpop.f32.mrb[32].mxu1 }
 0x138   :  { %v946_v50 = vmax.f32 %v2277_v49, 0.0  ;;  %v866_v52 = vpop.f32.mrb[33].mxu1  ;;  %v1741_v49 = vld [vmem:[%s3328_s4 + $0x8] sm:$0x3f] }
 0x139   :  { %2480 = vmatpush3.bf16.msra.mxu0 %v3169_v5  ;;  %v945_v53 = vmax.f32 %v866_v52, 0.0 }
 0x13a   :  { %2513 = vmatprep.subr.bf16.mxu0 %v2727_v23 }
 0x13b   :  { %v2570_v54 = vpack.c.bf16 %v946_v50, %v945_v53  ;;  %v2280_v55 = vpop.f32.mrb[34].mxu1 }
 0x13c   :  { %2150 = vmatmul.mubr.f32.vlgmr.msra.gmra.mrb[16].mxu0 %v216_v42  ;;  %v948_v56 = vmax.f32 %v2280_v55, 0.0  ;;  %v876_v57 = vpop.f32.mrb[35].mxu1 }
 0x13d   :  { %2515 = vmatpush3.bf16.msra.mxu0 %v3176_v12  ;;  %v947_v58 = vmax.f32 %v876_v57, 0.0  ;;  %2240 = vmatprep.mubr.msk.f32.mxu0 %vm2728_vm0, %v2729_v25 }
 0x13e   :  { %2516 = vmatprep.subr.bf16.mxu0 %v2727_v23 }
 0x13f   :  { %v2573_v59 = vpack.c.bf16 %v948_v56, %v947_v58  ;;  %v2283_v60 = vpop.f32.mrb[36].mxu1 }
 0x140   :  { %v950_v61 = vmax.f32 %v2283_v60, 0.0  ;;  %v886_v62 = vpop.f32.mrb[37].mxu1 }
 0x141   :  { %2518 = vmatpush3.bf16.msra.mxu0 %v2517_v18  ;;  %v949_v63 = vmax.f32 %v886_v62, 0.0 }
 0x142   :  { %2519 = vmatprep.subr.bf16.mxu0 %v2727_v23 }
 0x143   :  { %v2576_v1 = vpack.c.bf16 %v950_v61, %v949_v63  ;;  %v2286_v2 = vpop.f32.mrb[38].mxu1 }
 0x144   :  { %v952_v3 = vmax.f32 %v2286_v2, 0.0  ;;  %v896_v4 = vpop.f32.mrb[39].mxu1 }
 0x145   :  { %2521 = vmatpush3.bf16.msra.mxu0 %v2520_v24  ;;  %v951_v5 = vmax.f32 %v896_v4, 0.0 }
 0x146   :  { %2522 = vmatprep.subr.bf16.mxu0 %v2727_v23 }
 0x147   :  { %v2579_v6 = vpack.c.bf16 %v952_v3, %v951_v5  ;;  %v2289_v7 = vpop.f32.mrb[40].mxu1 }
 0x148   :  { %v954_v8 = vmax.f32 %v2289_v7, 0.0  ;;  %v906_v9 = vpop.f32.mrb[41].mxu1 }
 0x149   :  { %2524 = vmatpush3.bf16.msra.mxu0 %v2523_v30  ;;  %v953_v10 = vmax.f32 %v906_v9, 0.0  ;;  %v712_v30 = vld [vmem:[%s3326_s2 + $0x10] sm:$0x3f] }
 0x14a   :  { %2525 = vmatprep.subr.bf16.mxu0 %v2727_v23 }
 0x14b   :  { %v2582_v11 = vpack.c.bf16 %v954_v8, %v953_v10  ;;  %v2292_v12 = vpop.f32.mrb[42].mxu1 }
 0x14c   :  { %v956_v14 = vmax.f32 %v2292_v12, 0.0  ;;  %v916_v15 = vpop.f32.mrb[43].mxu1 }
 0x14d   :  { %2527 = vmatpush3.bf16.msra.mxu0 %v2526_v51  ;;  %v955_v16 = vmax.f32 %v916_v15, 0.0 }
 0x14e   :  { %2528 = vmatprep.subr.bf16.mxu0 %v2727_v23 }
 0x14f   :  { %v2585_v17 = vpack.c.bf16 %v956_v14, %v955_v16  ;;  %v2295_v18 = vpop.f32.mrb[44].mxu1 }
 0x150   :  { %v958_v19 = vmax.f32 %v2295_v18, 0.0  ;;  %v926_v20 = vpop.f32.mrb[45].mxu1  ;;  %v1742_v18 = vld [vmem:[%s3328_s4 + $0x10] sm:$0x3f] }
 0x151   :  { %2530 = vmatpush3.bf16.msra.mxu0 %v2529_v0  ;;  %v957_v21 = vmax.f32 %v926_v20, 0.0 }
 0x152   :  { %2531 = vmatprep.subr.bf16.mxu0 %v2727_v23 }
 0x153   :  { %v2588_v22 = vpack.c.bf16 %v958_v19, %v957_v21  ;;  %v2298_v24 = vpop.f32.mrb[46].mxu1 }
 0x154   :  { %v960_v26 = vmax.f32 %v2298_v24, 0.0  ;;  %v936_v27 = vpop.f32.mrb[47].mxu1 }
 0x155   :  { %2533 = vmatpush3.bf16.msra.mxu0 %v2532_v13  ;;  %v959_v29 = vmax.f32 %v936_v27, 0.0  ;;  %v2730_v13 = vmov 17  }
 0x156   :  { %2534 = vmatprep.subr.bf16.mxu0 %v2727_v23  ;;  %2629 = vset.pattern.permute.xlu1 %v2730_v13 }
 0x157   :  { %v2591_v36 = vpack.c.bf16 %v960_v26, %v959_v29  ;;  %2630 = vset.pattern.permute.xlu0 %v2730_v13 }
 0x159   :  { %2536 = vmatpush3.bf16.msra.mxu0 %v2535_v28 }
 0x15a   :  { %2569 = vmatprep.subr.bf16.mxu0 %v2727_v23 }
 0x15c   :  { %2241 = vmatmul.mubr.f32.vlgmr.msra.gmra.mrb[16].mxu0 %v712_v30 }
 0x15d   :  { %2571 = vmatpush3.bf16.msra.mxu0 %v2570_v54  ;;  %2331 = vmatprep.mubr.msk.f32.mxu0 %vm2728_vm0, %v2729_v25  ;;  %v961_v25 = vld [vmem:[%s3326_s2 + $0x18] sm:$0x3f]  ;;  %s2731_s2 = smov 1  }
 0x15e   :  { %2572 = vmatprep.subr.bf16.mxu0 %v2727_v23 }
 0x161   :  { %2574 = vmatpush3.bf16.msra.mxu0 %v2573_v59 }
 0x162   :  { %2575 = vmatprep.subr.bf16.mxu0 %v2727_v23 }
 0x165   :  { %2577 = vmatpush3.bf16.msra.mxu0 %v2576_v1 }
 0x166   :  { %2578 = vmatprep.subr.bf16.mxu0 %v2727_v23 }
 0x169   :  { %2580 = vmatpush3.bf16.msra.mxu0 %v2579_v6 }
 0x16a   :  { %2581 = vmatprep.subr.bf16.mxu0 %v2727_v23 }
 0x16d   :  { %2583 = vmatpush3.bf16.msra.mxu0 %v2582_v11 }
 0x16e   :  { %2584 = vmatprep.subr.bf16.mxu0 %v2727_v23 }
 0x171   :  { %2586 = vmatpush3.bf16.msra.mxu0 %v2585_v17 }
 0x172   :  { %2587 = vmatprep.subr.bf16.mxu0 %v2727_v23 }
 0x175   :  { %2589 = vmatpush3.bf16.msra.mxu0 %v2588_v22 }
 0x176   :  { %2590 = vmatprep.subr.bf16.mxu0 %v2727_v23 }
 0x179   :  { %2592 = vmatpush3.bf16.msra.mxu0 %v2591_v36 }
 0x17c   :  { %2332 = vmatmul.mubr.f32.vlgmr.msra.gmra.mrb[16].mxu0 %v961_v25 }
 0x24f   :  { %v1028_v31 = vpop.f32.mrb[16].mxu0 }
 0x250   :  { %1033 = vst [vmem:[#allocation2] sm:$0x3] %v1028_v31  ;;  %v2333_v32 = vpop.f32.mrb[17].mxu0  ;;  %2367 = vmatmul.mubr.f32.vlgmr.msra.gmra.mrb[48].mxu1 %v1028_v31 }
 0x323   :  { %v1116_v34 = vpop.f32.mrb[48].mxu1 }
 0x324   :  { %v1121_v51 = vsub.f32 %v1116_v34, %v1120_v33  ;;  %v2368_v35 = vpop.f32.mrb[49].mxu1 }
 0x326   :  { %v1122_v37 = vmul.f32 %v1121_v51, %v1121_v51 }
 0x328   :  { %v1124_v23 = vsel %vm1123_vm1, %v1122_v37, 0.0 }
 0x329   :  { %1125 = vadd.xlane.f32.xlu0 %v1124_v23 }
 0x3b6   :  { %v1126_v38 = vpop.xlane.xlu0 %1125 }
 0x3b7   :  { %2631 = vrsqrt.f32 %v1126_v38  ;;  %vm1129_vm2 = vcmp.eq.f32.partialorder %v1126_v38, inf  ;;  %v1132_v40 = vand.u32 2147483648, %v1126_v38  ;;  %vm1131_vm3 = vcmp.eq.f32.partialorder %v1126_v38, 0.0 }
 0x3c1   :  { %v2632_v39 = vpop.eup %2631 }
 0x3c2   :  { %v1128_v0 = vmul.f32 %v2632_v39, %v1126_v38 }
 0x3c4   :  { %v1130_v41 = vsel %vm1129_vm2, %v1126_v38, %v1128_v0 }
 0x3c5   :  { %v1133_v43 = vsel %vm1131_vm3, %v1132_v40, %v1130_v41 }
 0x3c6   :  { %v1134_v44 = vadd.f32 %v1133_v43, %v1120_v33 }
 0x3c8   :  { %2633 = vrcp.f32 %v1134_v44 }
 0x3d2   :  { %v2634_v45 = vpop.eup %2633 }
 0x3d3   :  { %1137 = vrot.lane.b32.xlu0 %v2634_v45, %s2731_s2 }
 0x445   :  { %v1138_v46 = vpop.permute.xlu0 %1137 }
 0x446   :  { %v1140_v47 = vmul.f32 %v1138_v46, %v1120_v33 }
 0x448   :  { %1143 = vperm.xlu1 %2629, %v1140_v47   ;;  %v1150_v62 = vmul.f32 %v1140_v47, %v1138_v46  ;;  %v1148_v1 = vadd.f32 1.0, %v1140_v47 }
 0x44a   :  { %v1151_v2 = vmul.f32 %v1150_v62, %v1133_v43  ;;  %v1149_v6 = vmax.f32 %v1148_v1, 1e-12  ;;  %v1743_v43 = vld [vmem:[%s3328_s4 + $0x18] sm:$0x3f] }
 0x44c   :  { %v1152_v7 = vsub.f32 %v1148_v1, %v1151_v2 }
 0x44e   :  { %v1153_v12 = vmax.f32 %v1152_v7, 1e-12 }
 0x4c7   :  { %v1144_v48 = vpop.permute.xlu1 %1143 }
 0x4c8   :  { %v1146_v28 = vmul.f32 %v1144_v48, %v1121_v51 }
 0x4ca   :  { %v1147_v50 = vadd.f32 %v1146_v28, %v1116_v34 }
 0x4cc   :  { %v1156_v52 = vsub.f32 %v1147_v50, %v1741_v49 }
 0x4ce   :  { %v1157_v42 = vmul.f32 %v1156_v52, %v1156_v52 }
 0x4d0   :  { %v1158_v53 = vsel %vm1123_vm1, %v1157_v42, 0.0 }
 0x4d1   :  { %1159 = vadd.xlane.f32.xlu1 %v1158_v53 }
 0x55e   :  { %v1160_v54 = vpop.xlane.xlu1 %1159 }
 0x55f   :  { %2635 = vrsqrt.f32 %v1160_v54  ;;  %vm1163_vm4 = vcmp.eq.f32.partialorder %v1160_v54, inf  ;;  %v1166_v57 = vand.u32 2147483648, %v1160_v54  ;;  %vm1165_vm5 = vcmp.eq.f32.partialorder %v1160_v54, 0.0 }
 0x569   :  { %v2636_v55 = vpop.eup %2635 }
 0x56a   :  { %v1162_v56 = vmul.f32 %v2636_v55, %v1160_v54 }
 0x56c   :  { %v1164_v58 = vsel %vm1163_vm4, %v1160_v54, %v1162_v56 }
 0x56d   :  { %v1167_v59 = vsel %vm1165_vm5, %v1166_v57, %v1164_v58 }
 0x56e   :  { %v1168_v60 = vadd.f32 %v1741_v49, %v1167_v59 }
 0x570   :  { %2637 = vrcp.f32 %v1168_v60 }
 0x57a   :  { %v2638_v61 = vpop.eup %2637 }
 0x57b   :  { %1171 = vrot.lane.b32.xlu0 %v2638_v61, %s2731_s2 }
 0x5ed   :  { %v1172_v63 = vpop.permute.xlu0 %1171 }
 0x5ee   :  { %v1174_v3 = vmul.f32 %v1741_v49, %v1172_v63 }
 0x5f0   :  { %v1182_v4 = vadd.f32 1.0, %v1174_v3  ;;  %v1185_v5 = vmul.f32 %v1174_v3, %v1172_v63  ;;  %1177 = vperm.xlu0 %2630, %v1174_v3   ;;  %v1744_v3 = vld [vmem:[%s3328_s4 + $0x20] sm:$0x3f] }
 0x5f2   :  { %v1183_v8 = vmax.f32 %v1182_v4, 1e-12  ;;  %v1186_v9 = vmul.f32 %v1185_v5, %v1167_v59 }
 0x5f4   :  { %v1184_v10 = vmul.f32 %v1183_v8, %v1149_v6  ;;  %v1187_v11 = vsub.f32 %v1182_v4, %v1186_v9 }
 0x5f6   :  { %v1188_v14 = vmax.f32 %v1187_v11, 1e-12 }
 0x5f8   :  { %v1189_v15 = vmul.f32 %v1188_v14, %v1153_v12 }
 0x66f   :  { %v1178_v16 = vpop.permute.xlu0 %1177 }
 0x670   :  { %v1180_v17 = vmul.f32 %v1178_v16, %v1156_v52 }
 0x672   :  { %v1181_v19 = vadd.f32 %v1180_v17, %v1147_v50 }
 0x674   :  { %v1192_v20 = vsub.f32 %v1181_v19, %v1742_v18 }
 0x676   :  { %v1193_v21 = vmul.f32 %v1192_v20, %v1192_v20 }
 0x678   :  { %v1194_v22 = vsel %vm1123_vm1, %v1193_v21, 0.0 }
 0x679   :  { %1195 = vadd.xlane.f32.xlu0 %v1194_v22 }
 0x706   :  { %v1196_v24 = vpop.xlane.xlu0 %1195 }
 0x707   :  { %2639 = vrsqrt.f32 %v1196_v24  ;;  %vm1199_vm6 = vcmp.eq.f32.partialorder %v1196_v24, inf  ;;  %v1202_v29 = vand.u32 2147483648, %v1196_v24  ;;  %vm1201_vm7 = vcmp.eq.f32.partialorder %v1196_v24, 0.0 }
 0x711   :  { %v2640_v26 = vpop.eup %2639 }
 0x712   :  { %v1198_v27 = vmul.f32 %v2640_v26, %v1196_v24 }
 0x714   :  { %v1200_v36 = vsel %vm1199_vm6, %v1196_v24, %v1198_v27 }
 0x715   :  { %v1203_v30 = vsel %vm1201_vm7, %v1202_v29, %v1200_v36 }
 0x716   :  { %v1204_v25 = vadd.f32 %v1742_v18, %v1203_v30 }
 0x718   :  { %2641 = vrcp.f32 %v1204_v25  ;;  %v1745_v25 = vld [vmem:[%s3328_s4 + $0x28] sm:$0x3f] }
 0x722   :  { %v2642_v31 = vpop.eup %2641 }
 0x723   :  { %1207 = vrot.lane.b32.xlu1 %v2642_v31, %s2731_s2 }
 0x795   :  { %v1208_v32 = vpop.permute.xlu1 %1207 }
 0x796   :  { %v1210_v33 = vmul.f32 %v1742_v18, %v1208_v32 }
 0x798   :  { %v1218_v34 = vadd.f32 1.0, %v1210_v33  ;;  %v1221_v51 = vmul.f32 %v1210_v33, %v1208_v32  ;;  %1213 = vperm.xlu1 %2629, %v1210_v33  }
 0x79a   :  { %v1219_v35 = vmax.f32 %v1218_v34, 1e-12  ;;  %v1222_v37 = vmul.f32 %v1221_v51, %v1203_v30 }
 0x79c   :  { %v1220_v23 = vmul.f32 %v1219_v35, %v1184_v10  ;;  %v1223_v38 = vsub.f32 %v1218_v34, %v1222_v37 }
 0x79e   :  { %v1224_v39 = vmax.f32 %v1223_v38, 1e-12 }
 0x7a0   :  { %v1225_v0 = vmul.f32 %v1224_v39, %v1189_v15 }
 0x817   :  { %v1214_v40 = vpop.permute.xlu1 %1213 }
 0x818   :  { %v1216_v41 = vmul.f32 %v1214_v40, %v1192_v20 }
 0x81a   :  { %v1217_v44 = vadd.f32 %v1216_v41, %v1181_v19 }
 0x81c   :  { %v1228_v13 = vsub.f32 %v1217_v44, %v1743_v43 }
 0x81e   :  { %v1229_v45 = vmul.f32 %v1228_v13, %v1228_v13 }
 0x820   :  { %v1230_v46 = vsel %vm1123_vm1, %v1229_v45, 0.0 }
 0x821   :  { %1231 = vadd.xlane.f32.xlu1 %v1230_v46 }
 0x8ae   :  { %v1232_v47 = vpop.xlane.xlu1 %1231 }
 0x8af   :  { %2643 = vrsqrt.f32 %v1232_v47  ;;  %vm1235_vm8 = vcmp.eq.f32.partialorder %v1232_v47, inf  ;;  %v1238_v49 = vand.u32 2147483648, %v1232_v47  ;;  %vm1237_vm9 = vcmp.eq.f32.partialorder %v1232_v47, 0.0 }
 0x8b9   :  { %v2644_v48 = vpop.eup %2643 }
 0x8ba   :  { %v1234_v28 = vmul.f32 %v2644_v48, %v1232_v47 }
 0x8bc   :  { %v1236_v50 = vsel %vm1235_vm8, %v1232_v47, %v1234_v28 }
 0x8bd   :  { %v1239_v52 = vsel %vm1237_vm9, %v1238_v49, %v1236_v50 }
 0x8be   :  { %v1240_v42 = vadd.f32 %v1743_v43, %v1239_v52 }
 0x8c0   :  { %2645 = vrcp.f32 %v1240_v42  ;;  %v1746_v42 = vld [vmem:[%s3328_s4 + $0x30] sm:$0x3f] }
 0x8ca   :  { %v2646_v53 = vpop.eup %2645 }
 0x8cb   :  { %1243 = vrot.lane.b32.xlu0 %v2646_v53, %s2731_s2 }
 0x93d   :  { %v1244_v54 = vpop.permute.xlu0 %1243 }
 0x93e   :  { %v1246_v55 = vmul.f32 %v1743_v43, %v1244_v54 }
 0x940   :  { %v1254_v56 = vadd.f32 1.0, %v1246_v55  ;;  %v1257_v57 = vmul.f32 %v1246_v55, %v1244_v54  ;;  %1249 = vperm.xlu0 %2630, %v1246_v55  }
 0x942   :  { %v1255_v58 = vmax.f32 %v1254_v56, 1e-12  ;;  %v1258_v59 = vmul.f32 %v1257_v57, %v1239_v52 }
 0x944   :  { %v1256_v60 = vmul.f32 %v1255_v58, %v1220_v23  ;;  %v1259_v61 = vsub.f32 %v1254_v56, %v1258_v59 }
 0x946   :  { %v1260_v62 = vmax.f32 %v1259_v61, 1e-12 }
 0x948   :  { %v1261_v63 = vmul.f32 %v1260_v62, %v1225_v0 }
 0x9bf   :  { %v1250_v1 = vpop.permute.xlu0 %1249 }
 0x9c0   :  { %v1252_v2 = vmul.f32 %v1250_v1, %v1228_v13 }
 0x9c2   :  { %v1253_v4 = vadd.f32 %v1252_v2, %v1217_v44 }
 0x9c4   :  { %v1264_v5 = vsub.f32 %v1253_v4, %v1744_v3 }
 0x9c6   :  { %v1265_v6 = vmul.f32 %v1264_v5, %v1264_v5 }
 0x9c8   :  { %v1266_v7 = vsel %vm1123_vm1, %v1265_v6, 0.0 }
 0x9c9   :  { %1267 = vadd.xlane.f32.xlu0 %v1266_v7 }
 0xa56   :  { %v1268_v8 = vpop.xlane.xlu0 %1267 }
 0xa57   :  { %2647 = vrsqrt.f32 %v1268_v8  ;;  %vm1271_vm10 = vcmp.eq.f32.partialorder %v1268_v8, inf  ;;  %v1274_v11 = vand.u32 2147483648, %v1268_v8  ;;  %vm1273_vm11 = vcmp.eq.f32.partialorder %v1268_v8, 0.0 }
 0xa61   :  { %v2648_v9 = vpop.eup %2647 }
 0xa62   :  { %v1270_v10 = vmul.f32 %v2648_v9, %v1268_v8 }
 0xa64   :  { %v1272_v12 = vsel %vm1271_vm10, %v1268_v8, %v1270_v10 }
 0xa65   :  { %v1275_v14 = vsel %vm1273_vm11, %v1274_v11, %v1272_v12 }
 0xa66   :  { %v1276_v15 = vadd.f32 %v1744_v3, %v1275_v14 }
 0xa68   :  { %2649 = vrcp.f32 %v1276_v15  ;;  %v1747_v15 = vld [vmem:[%s3328_s4 + $0x38] sm:$0x3f] }
 0xa72   :  { %v2650_v16 = vpop.eup %2649 }
 0xa73   :  { %1279 = vrot.lane.b32.xlu1 %v2650_v16, %s2731_s2 }
 0xae5   :  { %v1280_v17 = vpop.permute.xlu1 %1279 }
 0xae6   :  { %v1282_v18 = vmul.f32 %v1744_v3, %v1280_v17 }
 0xae8   :  { %v1290_v19 = vadd.f32 1.0, %v1282_v18  ;;  %v1293_v20 = vmul.f32 %v1282_v18, %v1280_v17  ;;  %1285 = vperm.xlu1 %2629, %v1282_v18  }
 0xaea   :  { %v1291_v21 = vmax.f32 %v1290_v19, 1e-12  ;;  %v1294_v22 = vmul.f32 %v1293_v20, %v1275_v14 }
 0xaec   :  { %v1292_v24 = vmul.f32 %v1291_v21, %v1256_v60  ;;  %v1295_v26 = vsub.f32 %v1290_v19, %v1294_v22 }
 0xaee   :  { %v1296_v27 = vmax.f32 %v1295_v26, 1e-12 }
 0xaf0   :  { %v1297_v29 = vmul.f32 %v1296_v27, %v1261_v63 }
 0xb67   :  { %v1286_v36 = vpop.permute.xlu1 %1285 }
 0xb68   :  { %v1288_v30 = vmul.f32 %v1286_v36, %v1264_v5 }
 0xb6a   :  { %v1289_v31 = vadd.f32 %v1288_v30, %v1253_v4 }
 0xb6c   :  { %v1300_v32 = vsub.f32 %v1289_v31, %v1745_v25 }
 0xb6e   :  { %v1301_v33 = vmul.f32 %v1300_v32, %v1300_v32 }
 0xb70   :  { %v1302_v34 = vsel %vm1123_vm1, %v1301_v33, 0.0 }
 0xb71   :  { %1303 = vadd.xlane.f32.xlu1 %v1302_v34 }
 0xbfe   :  { %v1304_v51 = vpop.xlane.xlu1 %1303 }
 0xbff   :  { %2651 = vrsqrt.f32 %v1304_v51  ;;  %vm1307_vm12 = vcmp.eq.f32.partialorder %v1304_v51, inf  ;;  %v1310_v23 = vand.u32 2147483648, %v1304_v51  ;;  %vm1309_vm13 = vcmp.eq.f32.partialorder %v1304_v51, 0.0 }
 0xc09   :  { %v2652_v35 = vpop.eup %2651 }
 0xc0a   :  { %v1306_v37 = vmul.f32 %v2652_v35, %v1304_v51 }
 0xc0c   :  { %v1308_v38 = vsel %vm1307_vm12, %v1304_v51, %v1306_v37 }
 0xc0d   :  { %v1311_v39 = vsel %vm1309_vm13, %v1310_v23, %v1308_v38 }
 0xc0e   :  { %v1312_v0 = vadd.f32 %v1745_v25, %v1311_v39 }
 0xc10   :  { %2653 = vrcp.f32 %v1312_v0 }
 0xc1a   :  { %v2654_v40 = vpop.eup %2653 }
 0xc1b   :  { %1315 = vrot.lane.b32.xlu0 %v2654_v40, %s2731_s2 }
 0xc8d   :  { %v1316_v41 = vpop.permute.xlu0 %1315 }
 0xc8e   :  { %v1318_v43 = vmul.f32 %v1745_v25, %v1316_v41 }
 0xc90   :  { %v1326_v44 = vadd.f32 1.0, %v1318_v43  ;;  %v1329_v13 = vmul.f32 %v1318_v43, %v1316_v41  ;;  %1321 = vperm.xlu0 %2630, %v1318_v43  }
 0xc92   :  { %v1327_v45 = vmax.f32 %v1326_v44, 1e-12  ;;  %v1330_v46 = vmul.f32 %v1329_v13, %v1311_v39 }
 0xc94   :  { %v1328_v47 = vmul.f32 %v1327_v45, %v1292_v24  ;;  %v1331_v48 = vsub.f32 %v1326_v44, %v1330_v46 }
 0xc96   :  { %v1332_v28 = vmax.f32 %v1331_v48, 1e-12 }
 0xc98   :  { %v1333_v49 = vmul.f32 %v1332_v28, %v1297_v29 }
 0xd0f   :  { %v1322_v50 = vpop.permute.xlu0 %1321 }
 0xd10   :  { %v1324_v52 = vmul.f32 %v1322_v50, %v1300_v32 }
 0xd12   :  { %v1325_v53 = vadd.f32 %v1324_v52, %v1289_v31 }
 0xd14   :  { %v1336_v54 = vsub.f32 %v1325_v53, %v1746_v42 }
 0xd16   :  { %v1337_v55 = vmul.f32 %v1336_v54, %v1336_v54 }
 0xd18   :  { %v1338_v56 = vsel %vm1123_vm1, %v1337_v55, 0.0 }
 0xd19   :  { %1339 = vadd.xlane.f32.xlu0 %v1338_v56 }
 0xda6   :  { %v1340_v57 = vpop.xlane.xlu0 %1339 }
 0xda7   :  { %2655 = vrsqrt.f32 %v1340_v57  ;;  %vm1343_vm14 = vcmp.eq.f32.partialorder %v1340_v57, inf  ;;  %v1346_v60 = vand.u32 2147483648, %v1340_v57  ;;  %vm1345_vm15 = vcmp.eq.f32.partialorder %v1340_v57, 0.0 }
 0xdb1   :  { %v2656_v58 = vpop.eup %2655 }
 0xdb2   :  { %v1342_v59 = vmul.f32 %v2656_v58, %v1340_v57 }
 0xdb4   :  { %v1344_v61 = vsel %vm1343_vm14, %v1340_v57, %v1342_v59 }
 0xdb5   :  { %v1347_v62 = vsel %vm1345_vm15, %v1346_v60, %v1344_v61 }
 0xdb6   :  { %v1348_v63 = vadd.f32 %v1746_v42, %v1347_v62 }
 0xdb8   :  { %2657 = vrcp.f32 %v1348_v63  ;;  %v1749_v63 = vld [vmem:[%s3328_s4 + $0x48] sm:$0x3f] }
 0xdc2   :  { %v2658_v1 = vpop.eup %2657 }
 0xdc3   :  { %1351 = vrot.lane.b32.xlu1 %v2658_v1, %s2731_s2 }
 0xe35   :  { %v1352_v2 = vpop.permute.xlu1 %1351 }
 0xe36   :  { %v1354_v3 = vmul.f32 %v1746_v42, %v1352_v2 }
 0xe38   :  { %v1362_v4 = vadd.f32 1.0, %v1354_v3  ;;  %v1365_v5 = vmul.f32 %v1354_v3, %v1352_v2  ;;  %1357 = vperm.xlu1 %2629, %v1354_v3  }
 0xe3a   :  { %v1363_v6 = vmax.f32 %v1362_v4, 1e-12  ;;  %v1366_v7 = vmul.f32 %v1365_v5, %v1347_v62 }
 0xe3c   :  { %v1364_v8 = vmul.f32 %v1363_v6, %v1328_v47  ;;  %v1367_v9 = vsub.f32 %v1362_v4, %v1366_v7  ;;  %v1748_v47 = vld [vmem:[%s3328_s4 + $0x40] sm:$0x3f] }
 0xe3e   :  { %v1368_v10 = vmax.f32 %v1367_v9, 1e-12 }
 0xe40   :  { %v1369_v11 = vmul.f32 %v1368_v10, %v1333_v49 }
 0xeb7   :  { %v1358_v12 = vpop.permute.xlu1 %1357 }
 0xeb8   :  { %v1360_v14 = vmul.f32 %v1358_v12, %v1336_v54 }
 0xeba   :  { %v1361_v16 = vadd.f32 %v1360_v14, %v1325_v53 }
 0xebc   :  { %v1372_v17 = vsub.f32 %v1361_v16, %v1747_v15 }
 0xebe   :  { %v1373_v18 = vmul.f32 %v1372_v17, %v1372_v17 }
 0xec0   :  { %v1374_v19 = vsel %vm1123_vm1, %v1373_v18, 0.0 }
 0xec1   :  { %1375 = vadd.xlane.f32.xlu1 %v1374_v19 }
 0xf4e   :  { %v1376_v20 = vpop.xlane.xlu1 %1375 }
 0xf4f   :  { %2659 = vrsqrt.f32 %v1376_v20  ;;  %vm1379_vm0 = vcmp.eq.f32.partialorder %v1376_v20, inf  ;;  %v1382_v24 = vand.u32 2147483648, %v1376_v20  ;;  %vm1381_vm2 = vcmp.eq.f32.partialorder %v1376_v20, 0.0 }
 0xf59   :  { %v2660_v21 = vpop.eup %2659 }
 0xf5a   :  { %v1378_v22 = vmul.f32 %v2660_v21, %v1376_v20 }
 0xf5c   :  { %v1380_v26 = vsel %vm1379_vm0, %v1376_v20, %v1378_v22 }
 0xf5d   :  { %v1383_v27 = vsel %vm1381_vm2, %v1382_v24, %v1380_v26 }
 0xf5e   :  { %v1384_v29 = vadd.f32 %v1747_v15, %v1383_v27 }
 0xf60   :  { %2661 = vrcp.f32 %v1384_v29 }
 0xf6a   :  { %v2662_v36 = vpop.eup %2661 }
 0xf6b   :  { %1387 = vrot.lane.b32.xlu0 %v2662_v36, %s2731_s2 }
 0xfdd   :  { %v1388_v30 = vpop.permute.xlu0 %1387 }
 0xfde   :  { %v1390_v25 = vmul.f32 %v1747_v15, %v1388_v30 }
 0xfe0   :  { %v1398_v31 = vadd.f32 1.0, %v1390_v25  ;;  %v1401_v32 = vmul.f32 %v1390_v25, %v1388_v30  ;;  %1393 = vperm.xlu0 %2630, %v1390_v25  }
 0xfe2   :  { %v1399_v33 = vmax.f32 %v1398_v31, 1e-12  ;;  %v1402_v34 = vmul.f32 %v1401_v32, %v1383_v27 }
 0xfe4   :  { %v1400_v51 = vmul.f32 %v1399_v33, %v1364_v8  ;;  %v1403_v35 = vsub.f32 %v1398_v31, %v1402_v34  ;;  %v1750_v33 = vld [vmem:[%s3328_s4 + $0x50] sm:$0x3f] }
 0xfe6   :  { %v1404_v37 = vmax.f32 %v1403_v35, 1e-12  ;;  %v1406_v23 = vmax.f32 %v1400_v51, 1e-30 }
 0xfe8   :  { %v1405_v38 = vmul.f32 %v1404_v37, %v1369_v11  ;;  %2663 = vlog2.f32 %v1406_v23 }
 0xfea   :  { %v1411_v39 = vmax.f32 %v1405_v38, 1e-30 }
 0xfec   :  { %2665 = vlog2.f32 %v1411_v39 }
 0xff2   :  { %v2664_v0 = vpop.eup %2663 }
 0xff3   :  { %v1408_v40 = vmul.f32 0.6931472, %v2664_v0 }
 0xff5   :  { %v1409_v43 = vmul.f32 15.0, %v1408_v40 }
 0xff6   :  { %v2666_v41 = vpop.eup %2665 }
 0xff7   :  { %v1413_v44 = vmul.f32 0.6931472, %v2666_v41 }
 0xff9   :  { %v3265_v13 = vadd.f32 %v1413_v44, %v1409_v43 }
0x105f   :  { %v1394_v45 = vpop.permute.xlu0 %1393 }
0x1060   :  { %v1396_v46 = vmul.f32 %v1394_v45, %v1372_v17 }
0x1062   :  { %v1397_v48 = vadd.f32 %v1396_v46, %v1361_v16 }
0x1064   :  { %v1417_v28 = vsub.f32 %v1397_v48, %v1748_v47 }
0x1066   :  { %v1418_v49 = vmul.f32 %v1417_v28, %v1417_v28 }
0x1068   :  { %v1419_v50 = vsel %vm1123_vm1, %v1418_v49, 0.0 }
0x1069   :  { %1420 = vadd.xlane.f32.xlu0 %v1419_v50 }
0x10f6   :  { %v1421_v52 = vpop.xlane.xlu0 %1420 }
0x10f7   :  { %2667 = vrsqrt.f32 %v1421_v52  ;;  %vm1424_vm3 = vcmp.eq.f32.partialorder %v1421_v52, inf  ;;  %v1427_v54 = vand.u32 2147483648, %v1421_v52  ;;  %vm1426_vm4 = vcmp.eq.f32.partialorder %v1421_v52, 0.0 }
0x1101   :  { %v2668_v42 = vpop.eup %2667 }
0x1102   :  { %v1423_v53 = vmul.f32 %v2668_v42, %v1421_v52 }
0x1104   :  { %v1425_v55 = vsel %vm1424_vm3, %v1421_v52, %v1423_v53 }
0x1105   :  { %v1428_v56 = vsel %vm1426_vm4, %v1427_v54, %v1425_v55 }
0x1106   :  { %v1429_v57 = vadd.f32 %v1748_v47, %v1428_v56 }
0x1108   :  { %2669 = vrcp.f32 %v1429_v57 }
0x1112   :  { %v2670_v58 = vpop.eup %2669 }
0x1113   :  { %1432 = vrot.lane.b32.xlu1 %v2670_v58, %s2731_s2 }
0x1185   :  { %v1433_v59 = vpop.permute.xlu1 %1432 }
0x1186   :  { %v1435_v60 = vmul.f32 %v1748_v47, %v1433_v59 }
0x1188   :  { %1438 = vperm.xlu1 %2629, %v1435_v60   ;;  %v1445_v14 = vmul.f32 %v1435_v60, %v1433_v59  ;;  %v1443_v16 = vadd.f32 1.0, %v1435_v60 }
0x118a   :  { %v1446_v17 = vmul.f32 %v1445_v14, %v1428_v56  ;;  %v1444_v21 = vmax.f32 %v1443_v16, 1e-12  ;;  %v1751_v56 = vld [vmem:[%s3328_s4 + $0x58] sm:$0x3f] }
0x118c   :  { %v1447_v22 = vsub.f32 %v1443_v16, %v1446_v17 }
0x118e   :  { %v1448_v36 = vmax.f32 %v1447_v22, 1e-12 }
0x1207   :  { %v1439_v61 = vpop.permute.xlu1 %1438 }
0x1208   :  { %v1441_v62 = vmul.f32 %v1439_v61, %v1417_v28 }
0x120a   :  { %v1442_v1 = vadd.f32 %v1441_v62, %v1397_v48 }
0x120c   :  { %v1451_v2 = vsub.f32 %v1442_v1, %v1749_v63 }
0x120e   :  { %v1452_v3 = vmul.f32 %v1451_v2, %v1451_v2 }
0x1210   :  { %v1453_v4 = vsel %vm1123_vm1, %v1452_v3, 0.0 }
0x1211   :  { %1454 = vadd.xlane.f32.xlu1 %v1453_v4 }
0x129e   :  { %v1455_v5 = vpop.xlane.xlu1 %1454 }
0x129f   :  { %2671 = vrsqrt.f32 %v1455_v5  ;;  %vm1458_vm5 = vcmp.eq.f32.partialorder %v1455_v5, inf  ;;  %v1461_v8 = vand.u32 2147483648, %v1455_v5  ;;  %vm1460_vm6 = vcmp.eq.f32.partialorder %v1455_v5, 0.0 }
0x12a9   :  { %v2672_v6 = vpop.eup %2671 }
0x12aa   :  { %v1457_v7 = vmul.f32 %v2672_v6, %v1455_v5 }
0x12ac   :  { %v1459_v9 = vsel %vm1458_vm5, %v1455_v5, %v1457_v7 }
0x12ad   :  { %v1462_v10 = vsel %vm1460_vm6, %v1461_v8, %v1459_v9 }
0x12ae   :  { %v1463_v11 = vadd.f32 %v1749_v63, %v1462_v10 }
0x12b0   :  { %2673 = vrcp.f32 %v1463_v11 }
0x12ba   :  { %v2674_v12 = vpop.eup %2673 }
0x12bb   :  { %1466 = vrot.lane.b32.xlu0 %v2674_v12, %s2731_s2 }
0x132d   :  { %v1467_v15 = vpop.permute.xlu0 %1466 }
0x132e   :  { %v1469_v18 = vmul.f32 %v1749_v63, %v1467_v15 }
0x1330   :  { %v1477_v19 = vadd.f32 1.0, %v1469_v18  ;;  %v1480_v20 = vmul.f32 %v1469_v18, %v1467_v15  ;;  %1472 = vperm.xlu0 %2630, %v1469_v18  }
0x1332   :  { %v1478_v24 = vmax.f32 %v1477_v19, 1e-12  ;;  %v1481_v26 = vmul.f32 %v1480_v20, %v1462_v10 }
0x1334   :  { %v1479_v27 = vmul.f32 %v1478_v24, %v1444_v21  ;;  %v1482_v29 = vsub.f32 %v1477_v19, %v1481_v26  ;;  %v1752_v19 = vld [vmem:[%s3328_s4 + $0x60] sm:$0x3f] }
0x1336   :  { %v1483_v30 = vmax.f32 %v1482_v29, 1e-12 }
0x1338   :  { %v1484_v25 = vmul.f32 %v1483_v30, %v1448_v36 }
0x13af   :  { %v1473_v31 = vpop.permute.xlu0 %1472 }
0x13b0   :  { %v1475_v32 = vmul.f32 %v1473_v31, %v1451_v2 }
0x13b2   :  { %v1476_v34 = vadd.f32 %v1475_v32, %v1442_v1 }
0x13b4   :  { %v1487_v51 = vsub.f32 %v1476_v34, %v1750_v33 }
0x13b6   :  { %v1488_v35 = vmul.f32 %v1487_v51, %v1487_v51 }
0x13b8   :  { %v1489_v37 = vsel %vm1123_vm1, %v1488_v35, 0.0 }
0x13b9   :  { %1490 = vadd.xlane.f32.xlu0 %v1489_v37 }
0x1446   :  { %v1491_v23 = vpop.xlane.xlu0 %1490 }
0x1447   :  { %2675 = vrsqrt.f32 %v1491_v23  ;;  %vm1494_vm7 = vcmp.eq.f32.partialorder %v1491_v23, inf  ;;  %v1497_v0 = vand.u32 2147483648, %v1491_v23  ;;  %vm1496_vm8 = vcmp.eq.f32.partialorder %v1491_v23, 0.0 }
0x1451   :  { %v2676_v38 = vpop.eup %2675 }
0x1452   :  { %v1493_v39 = vmul.f32 %v2676_v38, %v1491_v23 }
0x1454   :  { %v1495_v40 = vsel %vm1494_vm7, %v1491_v23, %v1493_v39 }
0x1455   :  { %v1498_v41 = vsel %vm1496_vm8, %v1497_v0, %v1495_v40 }
0x1456   :  { %v1499_v43 = vadd.f32 %v1750_v33, %v1498_v41 }
0x1458   :  { %2677 = vrcp.f32 %v1499_v43 }
0x1462   :  { %v2678_v44 = vpop.eup %2677 }
0x1463   :  { %1502 = vrot.lane.b32.xlu1 %v2678_v44, %s2731_s2  ;;  %v1753_v44 = vld [vmem:[%s3328_s4 + $0x68] sm:$0x3f] }
0x14d5   :  { %v1503_v45 = vpop.permute.xlu1 %1502 }
0x14d6   :  { %v1505_v46 = vmul.f32 %v1750_v33, %v1503_v45 }
0x14d8   :  { %v1513_v47 = vadd.f32 1.0, %v1505_v46  ;;  %v1516_v48 = vmul.f32 %v1505_v46, %v1503_v45  ;;  %1508 = vperm.xlu1 %2629, %v1505_v46  }
0x14da   :  { %v1514_v28 = vmax.f32 %v1513_v47, 1e-12  ;;  %v1517_v49 = vmul.f32 %v1516_v48, %v1498_v41 }
0x14dc   :  { %v1515_v50 = vmul.f32 %v1514_v28, %v1479_v27  ;;  %v1518_v52 = vsub.f32 %v1513_v47, %v1517_v49 }
0x14de   :  { %v1519_v42 = vmax.f32 %v1518_v52, 1e-12 }
0x14e0   :  { %v1520_v53 = vmul.f32 %v1519_v42, %v1484_v25 }
0x1557   :  { %v1509_v54 = vpop.permute.xlu1 %1508 }
0x1558   :  { %v1511_v55 = vmul.f32 %v1509_v54, %v1487_v51 }
0x155a   :  { %v1512_v57 = vadd.f32 %v1511_v55, %v1476_v34 }
0x155c   :  { %v1523_v58 = vsub.f32 %v1512_v57, %v1751_v56 }
0x155e   :  { %v1524_v59 = vmul.f32 %v1523_v58, %v1523_v58 }
0x1560   :  { %v1525_v60 = vsel %vm1123_vm1, %v1524_v59, 0.0 }
0x1561   :  { %1526 = vadd.xlane.f32.xlu1 %v1525_v60 }
0x15ee   :  { %v1527_v61 = vpop.xlane.xlu1 %1526 }
0x15ef   :  { %2679 = vrsqrt.f32 %v1527_v61  ;;  %vm1530_vm9 = vcmp.eq.f32.partialorder %v1527_v61, inf  ;;  %v1533_v1 = vand.u32 2147483648, %v1527_v61  ;;  %vm1532_vm10 = vcmp.eq.f32.partialorder %v1527_v61, 0.0 }
0x15f9   :  { %v2680_v62 = vpop.eup %2679 }
0x15fa   :  { %v1529_v63 = vmul.f32 %v2680_v62, %v1527_v61 }
0x15fc   :  { %v1531_v2 = vsel %vm1530_vm9, %v1527_v61, %v1529_v63 }
0x15fd   :  { %v1534_v3 = vsel %vm1532_vm10, %v1533_v1, %v1531_v2 }
0x15fe   :  { %v1535_v4 = vadd.f32 %v1751_v56, %v1534_v3 }
0x1600   :  { %2681 = vrcp.f32 %v1535_v4 }
0x160a   :  { %v2682_v5 = vpop.eup %2681 }
0x160b   :  { %1538 = vrot.lane.b32.xlu0 %v2682_v5, %s2731_s2  ;;  %v1754_v5 = vld [vmem:[%s3328_s4 + $0x70] sm:$0x3f] }
0x167d   :  { %v1539_v6 = vpop.permute.xlu0 %1538 }
0x167e   :  { %v1541_v7 = vmul.f32 %v1751_v56, %v1539_v6 }
0x1680   :  { %v1549_v8 = vadd.f32 1.0, %v1541_v7  ;;  %v1552_v9 = vmul.f32 %v1541_v7, %v1539_v6  ;;  %1544 = vperm.xlu0 %2630, %v1541_v7  }
0x1682   :  { %v1550_v10 = vmax.f32 %v1549_v8, 1e-12  ;;  %v1553_v11 = vmul.f32 %v1552_v9, %v1534_v3 }
0x1684   :  { %v1551_v12 = vmul.f32 %v1550_v10, %v1515_v50  ;;  %v1554_v14 = vsub.f32 %v1549_v8, %v1553_v11 }
0x1686   :  { %v1555_v15 = vmax.f32 %v1554_v14, 1e-12 }
0x1688   :  { %v1556_v16 = vmul.f32 %v1555_v15, %v1520_v53 }
0x16ff   :  { %v1545_v17 = vpop.permute.xlu0 %1544 }
0x1700   :  { %v1547_v18 = vmul.f32 %v1545_v17, %v1523_v58 }
0x1702   :  { %v1548_v20 = vadd.f32 %v1547_v18, %v1512_v57 }
0x1704   :  { %v1559_v21 = vsub.f32 %v1548_v20, %v1752_v19 }
0x1706   :  { %v1560_v22 = vmul.f32 %v1559_v21, %v1559_v21 }
0x1708   :  { %v1561_v24 = vsel %vm1123_vm1, %v1560_v22, 0.0 }
0x1709   :  { %1562 = vadd.xlane.f32.xlu0 %v1561_v24 }
0x1796   :  { %v1563_v26 = vpop.xlane.xlu0 %1562 }
0x1797   :  { %2683 = vrsqrt.f32 %v1563_v26  ;;  %vm1566_vm11 = vcmp.eq.f32.partialorder %v1563_v26, inf  ;;  %v1569_v36 = vand.u32 2147483648, %v1563_v26  ;;  %vm1568_vm12 = vcmp.eq.f32.partialorder %v1563_v26, 0.0 }
0x17a1   :  { %v2684_v27 = vpop.eup %2683 }
0x17a2   :  { %v1565_v29 = vmul.f32 %v2684_v27, %v1563_v26 }
0x17a4   :  { %v1567_v30 = vsel %vm1566_vm11, %v1563_v26, %v1565_v29 }
0x17a5   :  { %v1570_v25 = vsel %vm1568_vm12, %v1569_v36, %v1567_v30 }
0x17a6   :  { %v1571_v31 = vadd.f32 %v1752_v19, %v1570_v25 }
0x17a8   :  { %2685 = vrcp.f32 %v1571_v31 }
0x17b2   :  { %v2686_v32 = vpop.eup %2685 }
0x17b3   :  { %1574 = vrot.lane.b32.xlu1 %v2686_v32, %s2731_s2  ;;  %v1755_v32 = vld [vmem:[%s3328_s4 + $0x78] sm:$0x3f]  ;;  %s2732_s4 = smov [#allocation2]  }
0x1825   :  { %v1575_v33 = vpop.permute.xlu1 %1574 }
0x1826   :  { %v1577_v34 = vmul.f32 %v1752_v19, %v1575_v33 }
0x1828   :  { %v1585_v51 = vadd.f32 1.0, %v1577_v34  ;;  %v1588_v35 = vmul.f32 %v1577_v34, %v1575_v33  ;;  %1580 = vperm.xlu1 %2629, %v1577_v34  }
0x182a   :  { %v1586_v37 = vmax.f32 %v1585_v51, 1e-12  ;;  %v1589_v23 = vmul.f32 %v1588_v35, %v1570_v25 }
0x182c   :  { %v1587_v38 = vmul.f32 %v1586_v37, %v1551_v12  ;;  %v1590_v39 = vsub.f32 %v1585_v51, %v1589_v23 }
0x182e   :  { %v1591_v0 = vmax.f32 %v1590_v39, 1e-12 }
0x1830   :  { %v1592_v40 = vmul.f32 %v1591_v0, %v1556_v16 }
0x18a7   :  { %v1581_v41 = vpop.permute.xlu1 %1580 }
0x18a8   :  { %v1583_v43 = vmul.f32 %v1581_v41, %v1559_v21 }
0x18aa   :  { %v1584_v45 = vadd.f32 %v1583_v43, %v1548_v20 }
0x18ac   :  { %v1595_v46 = vsub.f32 %v1584_v45, %v1753_v44 }
0x18ae   :  { %v1596_v47 = vmul.f32 %v1595_v46, %v1595_v46 }
0x18b0   :  { %v1597_v48 = vsel %vm1123_vm1, %v1596_v47, 0.0 }
0x18b1   :  { %1598 = vadd.xlane.f32.xlu1 %v1597_v48 }
0x193e   :  { %v1599_v28 = vpop.xlane.xlu1 %1598 }
0x193f   :  { %2687 = vrsqrt.f32 %v1599_v28  ;;  %vm1602_vm13 = vcmp.eq.f32.partialorder %v1599_v28, inf  ;;  %v1605_v52 = vand.u32 2147483648, %v1599_v28  ;;  %vm1604_vm14 = vcmp.eq.f32.partialorder %v1599_v28, 0.0 }
0x1949   :  { %v2688_v49 = vpop.eup %2687 }
0x194a   :  { %v1601_v50 = vmul.f32 %v2688_v49, %v1599_v28 }
0x194c   :  { %v1603_v42 = vsel %vm1602_vm13, %v1599_v28, %v1601_v50 }
0x194d   :  { %v1606_v53 = vsel %vm1604_vm14, %v1605_v52, %v1603_v42 }
0x194e   :  { %v1607_v54 = vadd.f32 %v1753_v44, %v1606_v53 }
0x1950   :  { %2689 = vrcp.f32 %v1607_v54 }
0x195a   :  { %v2690_v55 = vpop.eup %2689 }
0x195b   :  { %1610 = vrot.lane.b32.xlu0 %v2690_v55, %s2731_s2 }
0x19cd   :  { %v1611_v56 = vpop.permute.xlu0 %1610 }
0x19ce   :  { %v1613_v57 = vmul.f32 %v1753_v44, %v1611_v56 }
0x19d0   :  { %v1621_v58 = vadd.f32 1.0, %v1613_v57  ;;  %v1624_v59 = vmul.f32 %v1613_v57, %v1611_v56  ;;  %1616 = vperm.xlu0 %2630, %v1613_v57  }
0x19d2   :  { %v1622_v60 = vmax.f32 %v1621_v58, 1e-12  ;;  %v1625_v61 = vmul.f32 %v1624_v59, %v1606_v53 }
0x19d4   :  { %v1623_v62 = vmul.f32 %v1622_v60, %v1587_v38  ;;  %v1626_v63 = vsub.f32 %v1621_v58, %v1625_v61 }
0x19d6   :  { %v1627_v1 = vmax.f32 %v1626_v63, 1e-12 }
0x19d8   :  { %v1628_v2 = vmul.f32 %v1627_v1, %v1592_v40 }
0x1a4f   :  { %v1617_v3 = vpop.permute.xlu0 %1616 }
0x1a50   :  { %v1619_v4 = vmul.f32 %v1617_v3, %v1595_v46 }
0x1a52   :  { %v1620_v6 = vadd.f32 %v1619_v4, %v1584_v45 }
0x1a54   :  { %v1631_v7 = vsub.f32 %v1620_v6, %v1754_v5 }
0x1a56   :  { %v1632_v8 = vmul.f32 %v1631_v7, %v1631_v7 }
0x1a58   :  { %v1633_v9 = vsel %vm1123_vm1, %v1632_v8, 0.0 }
0x1a59   :  { %1634 = vadd.xlane.f32.xlu0 %v1633_v9 }
0x1ae6   :  { %v1635_v10 = vpop.xlane.xlu0 %1634 }
0x1ae7   :  { %2691 = vrsqrt.f32 %v1635_v10  ;;  %vm1638_vm15 = vcmp.eq.f32.partialorder %v1635_v10, inf  ;;  %v1641_v14 = vand.u32 2147483648, %v1635_v10  ;;  %vm1640_vm0 = vcmp.eq.f32.partialorder %v1635_v10, 0.0 }
0x1af1   :  { %v2692_v11 = vpop.eup %2691 }
0x1af2   :  { %v1637_v12 = vmul.f32 %v2692_v11, %v1635_v10 }
0x1af4   :  { %v1639_v15 = vsel %vm1638_vm15, %v1635_v10, %v1637_v12 }
0x1af5   :  { %v1642_v16 = vsel %vm1640_vm0, %v1641_v14, %v1639_v15 }
0x1af6   :  { %v1643_v17 = vadd.f32 %v1754_v5, %v1642_v16 }
0x1af8   :  { %2693 = vrcp.f32 %v1643_v17 }
0x1b02   :  { %v2694_v18 = vpop.eup %2693 }
0x1b03   :  { %1646 = vrot.lane.b32.xlu1 %v2694_v18, %s2731_s2 }
0x1b75   :  { %v1647_v19 = vpop.permute.xlu1 %1646 }
0x1b76   :  { %v1649_v20 = vmul.f32 %v1754_v5, %v1647_v19 }
0x1b78   :  { %v1657_v21 = vadd.f32 1.0, %v1649_v20  ;;  %v1660_v22 = vmul.f32 %v1649_v20, %v1647_v19  ;;  %1652 = vperm.xlu1 %2629, %v1649_v20  }
0x1b7a   :  { %v1658_v24 = vmax.f32 %v1657_v21, 1e-12  ;;  %v1661_v26 = vmul.f32 %v1660_v22, %v1642_v16 }
0x1b7c   :  { %v1659_v27 = vmul.f32 %v1658_v24, %v1623_v62  ;;  %v1662_v29 = vsub.f32 %v1657_v21, %v1661_v26 }
0x1b7e   :  { %v1663_v36 = vmax.f32 %v1662_v29, 1e-12 }
0x1b80   :  { %v1664_v30 = vmul.f32 %v1663_v36, %v1628_v2 }
0x1bf7   :  { %v1653_v25 = vpop.permute.xlu1 %1652 }
0x1bf8   :  { %v1655_v31 = vmul.f32 %v1653_v25, %v1631_v7 }
0x1bfa   :  { %v1656_v33 = vadd.f32 %v1655_v31, %v1620_v6 }
0x1bfc   :  { %v1667_v34 = vsub.f32 %v1656_v33, %v1755_v32 }
0x1bfe   :  { %v1668_v51 = vmul.f32 %v1667_v34, %v1667_v34 }
0x1c00   :  { %v1669_v35 = vsel %vm1123_vm1, %v1668_v51, 0.0 }
0x1c01   :  { %1670 = vadd.xlane.f32.xlu1 %v1669_v35 }
0x1c8e   :  { %v1671_v37 = vpop.xlane.xlu1 %1670 }
0x1c8f   :  { %2695 = vrsqrt.f32 %v1671_v37  ;;  %vm1674_vm2 = vcmp.eq.f32.partialorder %v1671_v37, inf  ;;  %v1677_v39 = vand.u32 2147483648, %v1671_v37  ;;  %vm1676_vm3 = vcmp.eq.f32.partialorder %v1671_v37, 0.0 }
0x1c99   :  { %v2696_v23 = vpop.eup %2695 }
0x1c9a   :  { %v1673_v38 = vmul.f32 %v2696_v23, %v1671_v37 }
0x1c9c   :  { %v1675_v0 = vsel %vm1674_vm2, %v1671_v37, %v1673_v38 }
0x1c9d   :  { %v1678_v40 = vsel %vm1676_vm3, %v1677_v39, %v1675_v0 }
0x1c9e   :  { %v1679_v41 = vadd.f32 %v1755_v32, %v1678_v40 }
0x1ca0   :  { %2697 = vrcp.f32 %v1679_v41 }
0x1caa   :  { %v2698_v43 = vpop.eup %2697 }
0x1cab   :  { %1682 = vrot.lane.b32.xlu0 %v2698_v43, %s2731_s2  ;;  %s1729_s2 = sshll.u32 %s2732_s4, 4  ;;  %s1730_s2 = int_to_ptr.vmem [resolvable:$true] %s1729_s2 }
0x1cac   :  { %s2703_s24 = scalar_lea.vmem %s1730_s2, 32  ;;  %p2708_p1 = scmp.lt.s32.totalorder %s1730_s2, %s1730_s2 }
0x1cad   :  { %p2704_p0 = scmp.ne.s32.totalorder %s1730_s2, %s2703_s24  ;;  %p2709_p2 = scmp.lt.s32.totalorder %s2703_s24, %s2703_s24 }
0x1caf   :  { %p2710_p3 = por %p2709_p2, %p2708_p1 }
0x1cb1   :  { %p2711_p4 = pnand %p2710_p3, %p2704_p0 }
0x1d1d   :  { %v1683_v44 = vpop.permute.xlu0 %1682 }
0x1d1e   :  { %v1685_v45 = vmul.f32 %v1755_v32, %v1683_v44 }
0x1d20   :  { %v1693_v46 = vadd.f32 1.0, %v1685_v45  ;;  %v1696_v47 = vmul.f32 %v1685_v45, %v1683_v44  ;;  %1688 = vperm.xlu0 %2630, %v1685_v45  }
0x1d22   :  { %v1694_v48 = vmax.f32 %v1693_v46, 1e-12  ;;  %v1697_v28 = vmul.f32 %v1696_v47, %v1678_v40 }
0x1d24   :  { %v1695_v49 = vmul.f32 %v1694_v48, %v1659_v27  ;;  %v1698_v50 = vsub.f32 %v1693_v46, %v1697_v28 }
0x1d26   :  { %v1699_v52 = vmax.f32 %v1698_v50, 1e-12  ;;  %v1701_v42 = vmax.f32 %v1695_v49, 1e-30 }
0x1d28   :  { %v1700_v53 = vmul.f32 %v1699_v52, %v1664_v30  ;;  %2699 = vlog2.f32 %v1701_v42 }
0x1d2a   :  { %v1706_v54 = vmax.f32 %v1700_v53, 1e-30 }
0x1d2c   :  { %2701 = vlog2.f32 %v1706_v54 }
0x1d32   :  { %v2700_v55 = vpop.eup %2699 }
0x1d33   :  { %v1703_v56 = vmul.f32 0.6931472, %v2700_v55 }
0x1d35   :  { %v1704_v57 = vmul.f32 15.0, %v1703_v56 }
0x1d36   :  { %v2702_v58 = vpop.eup %2701 }
0x1d37   :  { %v1705_v59 = vadd.f32 %v1704_v57, %v3265_v13  ;;  %v1708_v60 = vmul.f32 0.6931472, %v2702_v58 }
0x1d39   :  { %v1709_v61 = vadd.f32 %v1708_v60, %v1705_v59 }
0x1d9f   :  { %v1689_v62 = vpop.permute.xlu0 %1688 }
0x1da0   :  { %v1691_v63 = vmul.f32 %v1689_v62, %v1667_v34 }
0x1da2   :  { %v1692_v1 = vadd.f32 %v1691_v63, %v1656_v33 }
0x1da4   :  { %v1710_v2 = vmul.f32 %v1692_v1, %v1692_v1 }
0x1da6   :  { %v1711_v3 = vsel %vm1123_vm1, %v1710_v2, 0.0 }
0x1da7   :  { %1712 = vadd.xlane.f32.xlu0 %v1711_v3 }
0x1e34   :  { %v1713_v4 = vpop.xlane.xlu0 %1712 }
0x1e35   :  { %v1714_v5 = vmul.f32 -0.5, %v1713_v4 }
0x1e37   :  { %v1756_v6 = vadd.f32 -14.703016, %v1714_v5 }
0x1e39   :  { %v1716_v7 = vadd.f32 %v1756_v6, %v1709_v61 }
0x1e3b   :  { %1719 = vperm.xlu1 %2629, %v1716_v7  }
0x1e3c   :  { %2714 = shalt.err (!%p2711_p4)
}
0x1e3d   :  { %s2715_s27 = scalar_lea.hbm %s3329_s5, 32 }
0x1e3e   :  { %p2716_p5 = scmp.ne.s32.totalorder %s3329_s5, %s2715_s27  ;;  %p2719_p6 = scmp.lt.u32.totalorder %s2715_s27, %s3329_s5 }
0x1e40   :  { %p2721_p7 = pnand %p2719_p6, %p2716_p5 }
0x1e42   :  { %2724 = shalt.err (!%p2721_p7)
}
0x1e43   :  { %1732 = dma.vmem_to_hbm [thread:$0]  %s1730_s2, 32, %s3329_s5, [#allocation3]  }
0x1eba   :  { %v1720_v13 = vpop.permute.xlu1 %1719 }
0x1ebb   :  { %1722 = vst [vmem:[%s3330_s6] sm:$0x3f] %v1720_v13 }
0x1ebc   :  { %2725 = dma.done.wait [#allocation3], 32  }
0x1ebd   :  { %2726 = vsyncadd [#allocation3], 4294967264 }
0x1ebe   :  { %1740 = vsyncpa [#allocation3], 1 }

</bundles_post_ra>
